<compile_context>
chip_gen: v7x
topology: tpu7x:2x2x1
jax: 0.10.0
libtpu: 0.0.40
codegen_flags: <defaults>
</compile_context>

<pallas_src>
import functools

import numpy as np
import jax
import jax.numpy as jnp
from jax import lax
from jax.experimental import pallas as pl
from jax.experimental.pallas import tpu as pltpu


# ---------------------------------------------------------------------------
# Fused Pallas kernel: (ReLU -> depthwise KxK -> 1x1 -> BN) x 2, one image
# ---------------------------------------------------------------------------

def _sepconv_fused_kernel(x_ref, sel_ref, dw1_ref, pw1_ref, s1_ref, b1_ref,
                          dw2_ref, pw2_ref, s2_ref, b2_ref, o_ref,
                          xpad1, xpad2, *, kh, kw, pad, stride):
    """One NHWC image, both separable blocks, entirely in VMEM."""
    H, W, c_in = x_ref.shape[1], x_ref.shape[2], x_ref.shape[3]
    Ho, Wo, c_out_p = o_ref.shape[1], o_ref.shape[2], o_ref.shape[3]
    Hp1, Wp1 = H + 2 * pad, W + 2 * pad
    Hp2, Wp2 = Ho + 2 * pad, Wo + 2 * pad

    # Zero only the halo strips (interiors are fully rewritten below) instead
    # of clearing the whole padded scratch every grid step.
    if pad > 0:
        xpad1[0:pad, :, :] = jnp.zeros((pad, Wp1, c_in), jnp.float32)
        xpad1[pad + H:Hp1, :, :] = jnp.zeros((pad, Wp1, c_in), jnp.float32)
        xpad1[:, 0:pad, :] = jnp.zeros((Hp1, pad, c_in), jnp.float32)
        xpad1[:, pad + W:Wp1, :] = jnp.zeros((Hp1, pad, c_in), jnp.float32)
        xpad2[0:pad, :, :] = jnp.zeros((pad, Wp2, c_in), jnp.float32)
        xpad2[pad + Ho:Hp2, :, :] = jnp.zeros((pad, Wp2, c_in), jnp.float32)
        xpad2[:, 0:pad, :] = jnp.zeros((Hp2, pad, c_in), jnp.float32)
        xpad2[:, pad + Wo:Wp2, :] = jnp.zeros((Hp2, pad, c_in), jnp.float32)

    # ---- Block 1: ReLU -> depthwise KxK (stride) -> 1x1 -> BN ----
    xpad1[pad:pad + H, pad:pad + W, :] = jnp.maximum(x_ref[0], 0.0)

    # TODO(synk): kj=1,2 window reads are unaligned sublane shifts; move them
    # onto the XLU with pltpu.roll if the vld/VALU path ever saturates.
    acc1 = jnp.zeros((H, W, c_in), jnp.float32)
    for ki in range(kh):
        for kj in range(kw):
            acc1 = acc1 + xpad1[ki:ki + H, kj:kj + W, :] * dw1_ref[ki * kw + kj, :]
    acc1 = acc1.reshape(H * W, c_in)
    if stride > 1:
        # Subsample to the strided output positions *before* the 1x1 matmul /
        # BN / block 2 (exact: constant 0/1 row selection, done on the MXU).
        acc1 = jnp.dot(sel_ref[...], acc1, preferred_element_type=jnp.float32)
    y1 = jnp.dot(acc1, pw1_ref[...], preferred_element_type=jnp.float32)
    y1 = y1 * s1_ref[...] + b1_ref[...]

    # ---- Block 2: ReLU -> depthwise KxK (stride 1) -> 1x1 -> BN ----
    xpad2[pad:pad + Ho, pad:pad + Wo, :] = jnp.maximum(y1, 0.0).reshape(Ho, Wo, c_in)

    acc2 = jnp.zeros((Ho, Wo, c_in), jnp.float32)
    for ki in range(kh):
        for kj in range(kw):
            acc2 = acc2 + xpad2[ki:ki + Ho, kj:kj + Wo, :] * dw2_ref[ki * kw + kj, :]
    y2 = jnp.dot(acc2.reshape(Ho * Wo, c_in), pw2_ref[...],
                 preferred_element_type=jnp.float32)
    y2 = y2 * s2_ref[...] + b2_ref[...]
    o_ref[0] = y2.reshape(Ho, Wo, c_out_p).astype(o_ref.dtype)


def sepconv_pallas(x_nhwc, sel, dw1, pw1, s1, b1, dw2, pw2, s2, b2,
                   *, kh, kw, pad, stride):
    """x_nhwc: (N,H,W,C_in); dw*: (KH*KW,C_in); pw1: (C_in,C_in); pw2: (C_in,C_pad)."""
    N, H, W, C_in = x_nhwc.shape
    C_pad = pw2.shape[1]
    Ho = (H + 2 * pad - kh) // stride + 1
    Wo = (W + 2 * pad - kw) // stride + 1
    kernel = functools.partial(_sepconv_fused_kernel, kh=kh, kw=kw, pad=pad,
                               stride=stride)
    return pl.pallas_call(
        kernel,
        out_shape=jax.ShapeDtypeStruct((N, Ho, Wo, C_pad), jnp.float32),
        grid=(N,),
        in_specs=[
            pl.BlockSpec((1, H, W, C_in), lambda n: (n, 0, 0, 0)),
            pl.BlockSpec(sel.shape, lambda n: (0, 0)),
            pl.BlockSpec((kh * kw, C_in), lambda n: (0, 0)),
            pl.BlockSpec((C_in, C_in), lambda n: (0, 0)),
            pl.BlockSpec((1, C_in), lambda n: (0, 0)),
            pl.BlockSpec((1, C_in), lambda n: (0, 0)),
            pl.BlockSpec((kh * kw, C_in), lambda n: (0, 0)),
            pl.BlockSpec((C_in, C_pad), lambda n: (0, 0)),
            pl.BlockSpec((1, C_pad), lambda n: (0, 0)),
            pl.BlockSpec((1, C_pad), lambda n: (0, 0)),
        ],
        out_specs=pl.BlockSpec((1, Ho, Wo, C_pad), lambda n: (n, 0, 0, 0)),
        scratch_shapes=[
            pltpu.VMEM((H + 2 * pad, W + 2 * pad, C_in), jnp.float32),
            pltpu.VMEM((Ho + 2 * pad, Wo + 2 * pad, C_in), jnp.float32),
        ],
        compiler_params=pltpu.CompilerParams(
            dimension_semantics=("parallel",),
            vmem_limit_bytes=32 * 1024 * 1024),
    )(x_nhwc, sel, dw1, pw1, s1, b1, dw2, pw2, s2, b2)


# ---------------------------------------------------------------------------
# Parameters & forward
# ---------------------------------------------------------------------------

def init_params(key, c_in, c_out, kernel_size=3):
    """PyTorch-default init, stored in kernel-friendly layouts (arrays only)."""
    k = kernel_size
    keys = jax.random.split(key, 4)

    def uconv(kk, shape, fan_in):
        bound = 1.0 / (fan_in ** 0.5)
        return jax.random.uniform(kk, shape, jnp.float32, -bound, bound)

    # Raw PyTorch-layout weights (used by the pure-JAX reference).
    dw1 = uconv(keys[0], (c_in, 1, k, k), k * k)            # depthwise, groups=c_in
    pw1 = uconv(keys[1], (c_in, c_in, 1, 1), c_in)
    dw2 = uconv(keys[2], (c_in, 1, k, k), k * k)
    pw2 = uconv(keys[3], (c_out, c_in, 1, 1), c_in)

    def fold_bn(c):
        # Eval-mode BatchNorm with PyTorch defaults: gamma=1, beta=0,
        # running_mean=0, running_var=1, eps=1e-5 -> per-channel scale/bias.
        gamma = jnp.ones((c,), jnp.float32)
        beta = jnp.zeros((c,), jnp.float32)
        mean = jnp.zeros((c,), jnp.float32)
        var = jnp.ones((c,), jnp.float32)
        eps = 1e-5
        scale = gamma / jnp.sqrt(var + eps)
        bias = beta - mean * scale
        return scale.reshape(1, c), bias.reshape(1, c)

    bn1_scale, bn1_bias = fold_bn(c_in)
    bn2_scale, bn2_bias = fold_bn(c_out)

    def dw_mat(w):   # (C, 1, K, K) -> (K*K, C)
        return jnp.transpose(w[:, 0, :, :], (1, 2, 0)).reshape(k * k, w.shape[0])

    def pw_mat(w):   # (Cout, Cin, 1, 1) -> (Cin, Cout)
        return jnp.transpose(w[:, :, 0, 0], (1, 0))

    params = {
        "dw1": dw_mat(dw1), "pw1": pw_mat(pw1),
        "bn1_scale": bn1_scale, "bn1_bias": bn1_bias,
        "dw2": dw_mat(dw2), "pw2": pw_mat(pw2),
        "bn2_scale": bn2_scale, "bn2_bias": bn2_bias,
    }
    raw = {"dw1": dw1, "pw1": pw1, "dw2": dw2, "pw2": pw2}
    return params, raw


@functools.partial(jax.jit, static_argnames=("stride", "kernel_size", "padding"))
def sepconv_forward(x_nchw, params, *, stride, kernel_size=3, padding=1):
    k, pad = kernel_size, padding
    # PyTorch interface is NCHW; convert once at the boundary.
    x = jnp.transpose(x_nchw, (0, 2, 3, 1))
    N, H, W, C_in = x.shape
    C_out = params["pw2"].shape[1]
    Ho = (H + 2 * pad - k) // stride + 1
    Wo = (W + 2 * pad - k) // stride + 1

    # Constant 0/1 selection matrix realizing the depthwise stride in-kernel.
    if stride > 1:
        rows = np.arange(Ho * Wo)
        src = (rows // Wo) * stride * W + (rows % Wo) * stride
        sel_np = np.zeros((Ho * Wo, H * W), np.float32)
        sel_np[rows, src] = 1.0
        sel = jnp.asarray(sel_np)
    else:
        sel = jnp.zeros((8, 128), jnp.float32)   # unused placeholder

    # Pad block-2 pointwise / BN to a lane-dense (multiple of 128) channel
    # count so the output store is unmasked; sliced off after the kernel.
    C_pad = ((C_out + 127) // 128) * 128
    pw2 = jnp.pad(params["pw2"], ((0, 0), (0, C_pad - C_out)))
    s2 = jnp.pad(params["bn2_scale"], ((0, 0), (0, C_pad - C_out)))
    b2 = jnp.pad(params["bn2_bias"], ((0, 0), (0, C_pad - C_out)))

    y = sepconv_pallas(x, sel, params["dw1"], params["pw1"],
                       params["bn1_scale"], params["bn1_bias"],
                       params["dw2"], pw2, s2, b2,
                       kh=k, kw=k, pad=pad, stride=stride)
    y = y[..., :C_out]
    return jnp.transpose(y, (0, 3, 1, 2))        # back to NCHW


# ---------------------------------------------------------------------------
# Pure-JAX reference (correctness smoke test)
# ---------------------------------------------------------------------------

def sepconv_reference(x_nchw, params, raw, stride, padding=1):
    def block(x, dw, pw, scale, bias, s):
        x = jnp.maximum(x, 0.0)
        x = lax.conv_general_dilated(
            x, jnp.transpose(dw, (2, 3, 1, 0)), (s, s),
            ((padding, padding), (padding, padding)),
            dimension_numbers=("NHWC", "HWIO", "NHWC"),
            feature_group_count=dw.shape[0],
            precision=lax.Precision.HIGHEST)
        x = lax.conv_general_dilated(
            x, jnp.transpose(pw, (2, 3, 1, 0)), (1, 1), "VALID",
            dimension_numbers=("NHWC", "HWIO", "NHWC"),
            precision=lax.Precision.HIGHEST)
        return x * scale + bias

    x = jnp.transpose(x_nchw, (0, 2, 3, 1))
    x = block(x, raw["dw1"], raw["pw1"],
              params["bn1_scale"][0], params["bn1_bias"][0], stride)
    x = block(x, raw["dw2"], raw["pw2"],
              params["bn2_scale"][0], params["bn2_bias"][0], 1)
    return jnp.transpose(x, (0, 3, 1, 2))


if __name__ == "__main__":
    B, C_IN, C_OUT, H, W = 2, 32, 64, 16, 16
    STRIDE = 2

    key = jax.random.PRNGKey(0)
    pkey, xkey = jax.random.split(key)
    params, raw = init_params(pkey, C_IN, C_OUT)
    x = jax.random.normal(xkey, (B, C_IN, H, W), jnp.float32)

    out = sepconv_forward(x, params, stride=STRIDE)
    out = jax.block_until_ready(out)
    assert out.shape == (B, C_OUT, H // STRIDE, W // STRIDE), out.shape
    assert bool(jnp.isfinite(out).all())

    ref = sepconv_reference(x, params, raw, STRIDE)
    max_err = float(jnp.max(jnp.abs(out - ref)))
    assert max_err < 5e-2, max_err

    print("KERNEL_OK")
</pallas_src>

<mosaic_0001>
module attributes {stable_mosaic.version = 11 : i64} {
  func.func @_sepconv_fused_kernel(%arg0: i32, %arg1: memref<1x16x16x32xf32, #tpu.memory_space<vmem>>, %arg2: memref<64x256xf32, #tpu.memory_space<vmem>>, %arg3: memref<9x32xf32, #tpu.memory_space<vmem>>, %arg4: memref<32x32xf32, #tpu.memory_space<vmem>>, %arg5: memref<1x32xf32, #tpu.memory_space<vmem>>, %arg6: memref<1x32xf32, #tpu.memory_space<vmem>>, %arg7: memref<9x32xf32, #tpu.memory_space<vmem>>, %arg8: memref<32x128xf32, #tpu.memory_space<vmem>>, %arg9: memref<1x128xf32, #tpu.memory_space<vmem>>, %arg10: memref<1x128xf32, #tpu.memory_space<vmem>>, %arg11: memref<1x8x8x128xf32, #tpu.memory_space<vmem>>, %arg12: memref<18x18x32xf32, #tpu.memory_space<vmem>>, %arg13: memref<10x10x32xf32, #tpu.memory_space<vmem>>) attributes {dimension_semantics = [#tpu.dimension_semantics<parallel>], iteration_bounds = array<i64: 2>, scalar_prefetch = 0 : i64, scratch_operands = 2 : i64, tpu.core_type = #tpu.core_type<tc>, window_params = [{transform_indices = @transform_0, window_bounds = array<i64: 1, 16, 16, 32>}, {pipeline_mode = #tpu.pipeline_mode<synchronous>, transform_indices = @transform_1, window_bounds = array<i64: 64, 256>}, {pipeline_mode = #tpu.pipeline_mode<synchronous>, transform_indices = @transform_2, window_bounds = array<i64: 9, 32>}, {pipeline_mode = #tpu.pipeline_mode<synchronous>, transform_indices = @transform_3, window_bounds = array<i64: 32, 32>}, {pipeline_mode = #tpu.pipeline_mode<synchronous>, transform_indices = @transform_4, window_bounds = array<i64: 1, 32>}, {pipeline_mode = #tpu.pipeline_mode<synchronous>, transform_indices = @transform_5, window_bounds = array<i64: 1, 32>}, {pipeline_mode = #tpu.pipeline_mode<synchronous>, transform_indices = @transform_6, window_bounds = array<i64: 9, 32>}, {pipeline_mode = #tpu.pipeline_mode<synchronous>, transform_indices = @transform_7, window_bounds = array<i64: 32, 128>}, {pipeline_mode = #tpu.pipeline_mode<synchronous>, transform_indices = @transform_8, window_bounds = array<i64: 1, 128>}, {pipeline_mode = #tpu.pipeline_mode<synchronous>, transform_indices = @transform_9, window_bounds = array<i64: 1, 128>}, {transform_indices = @transform_10, window_bounds = array<i64: 1, 8, 8, 128>}]} {
    %cst = arith.constant 0.000000e+00 : f32
    %0 = vector.broadcast %cst : f32 to vector<1x18x32xf32>
    %c0 = arith.constant 0 : index
    %c0_0 = arith.constant 0 : index
    %c0_1 = arith.constant 0 : index
    %1 = vector.load %arg12[%c0, %c0_0, %c0_1] : memref<18x18x32xf32, #tpu.memory_space<vmem>>, vector<1x18x32xf32>
    tpu.vector_store %arg12[%c0, %c0_0, %c0_1], %0 {strides = array<i32>} : memref<18x18x32xf32, #tpu.memory_space<vmem>>, vector<1x18x32xf32>,
    %cst_2 = arith.constant 0.000000e+00 : f32
    %2 = vector.broadcast %cst_2 : f32 to vector<1x18x32xf32>
    %c17 = arith.constant 17 : index
    %c0_3 = arith.constant 0 : index
    %c0_4 = arith.constant 0 : index
    %3 = vector.load %arg12[%c17, %c0_3, %c0_4] : memref<18x18x32xf32, #tpu.memory_space<vmem>>, vector<1x18x32xf32>
    tpu.vector_store %arg12[%c17, %c0_3, %c0_4], %2 {strides = array<i32>} : memref<18x18x32xf32, #tpu.memory_space<vmem>>, vector<1x18x32xf32>,
    %cst_5 = arith.constant 0.000000e+00 : f32
    %4 = vector.broadcast %cst_5 : f32 to vector<18x1x32xf32>
    %c0_6 = arith.constant 0 : index
    %c0_7 = arith.constant 0 : index
    %c0_8 = arith.constant 0 : index
    %5 = vector.load %arg12[%c0_6, %c0_7, %c0_8] : memref<18x18x32xf32, #tpu.memory_space<vmem>>, vector<18x1x32xf32>
    tpu.vector_store %arg12[%c0_6, %c0_7, %c0_8], %4 {strides = array<i32>} : memref<18x18x32xf32, #tpu.memory_space<vmem>>, vector<18x1x32xf32>,
    %cst_9 = arith.constant 0.000000e+00 : f32
    %6 = vector.broadcast %cst_9 : f32 to vector<18x1x32xf32>
    %c0_10 = arith.constant 0 : index
    %c17_11 = arith.constant 17 : index
    %c0_12 = arith.constant 0 : index
    %7 = vector.load %arg12[%c0_10, %c17_11, %c0_12] : memref<18x18x32xf32, #tpu.memory_space<vmem>>, vector<18x1x32xf32>
    tpu.vector_store %arg12[%c0_10, %c17_11, %c0_12], %6 {strides = array<i32>} : memref<18x18x32xf32, #tpu.memory_space<vmem>>, vector<18x1x32xf32>,
    %cst_13 = arith.constant 0.000000e+00 : f32
    %8 = vector.broadcast %cst_13 : f32 to vector<1x10x32xf32>
    %c0_14 = arith.constant 0 : index
    %c0_15 = arith.constant 0 : index
    %c0_16 = arith.constant 0 : index
    %9 = vector.load %arg13[%c0_14, %c0_15, %c0_16] : memref<10x10x32xf32, #tpu.memory_space<vmem>>, vector<1x10x32xf32>
    tpu.vector_store %arg13[%c0_14, %c0_15, %c0_16], %8 {strides = array<i32>} : memref<10x10x32xf32, #tpu.memory_space<vmem>>, vector<1x10x32xf32>,
    %cst_17 = arith.constant 0.000000e+00 : f32
    %10 = vector.broadcast %cst_17 : f32 to vector<1x10x32xf32>
    %c9 = arith.constant 9 : index
    %c0_18 = arith.constant 0 : index
    %c0_19 = arith.constant 0 : index
    %11 = vector.load %arg13[%c9, %c0_18, %c0_19] : memref<10x10x32xf32, #tpu.memory_space<vmem>>, vector<1x10x32xf32>
    tpu.vector_store %arg13[%c9, %c0_18, %c0_19], %10 {strides = array<i32>} : memref<10x10x32xf32, #tpu.memory_space<vmem>>, vector<1x10x32xf32>,
    %cst_20 = arith.constant 0.000000e+00 : f32
    %12 = vector.broadcast %cst_20 : f32 to vector<10x1x32xf32>
    %c0_21 = arith.constant 0 : index
    %c0_22 = arith.constant 0 : index
    %c0_23 = arith.constant 0 : index
    %13 = vector.load %arg13[%c0_21, %c0_22, %c0_23] : memref<10x10x32xf32, #tpu.memory_space<vmem>>, vector<10x1x32xf32>
    tpu.vector_store %arg13[%c0_21, %c0_22, %c0_23], %12 {strides = array<i32>} : memref<10x10x32xf32, #tpu.memory_space<vmem>>, vector<10x1x32xf32>,
    %cst_24 = arith.constant 0.000000e+00 : f32
    %14 = vector.broadcast %cst_24 : f32 to vector<10x1x32xf32>
    %c0_25 = arith.constant 0 : index
    %c9_26 = arith.constant 9 : index
    %c0_27 = arith.constant 0 : index
    %15 = vector.load %arg13[%c0_25, %c9_26, %c0_27] : memref<10x10x32xf32, #tpu.memory_space<vmem>>, vector<10x1x32xf32>
    tpu.vector_store %arg13[%c0_25, %c9_26, %c0_27], %14 {strides = array<i32>} : memref<10x10x32xf32, #tpu.memory_space<vmem>>, vector<10x1x32xf32>,
    %c0_28 = arith.constant 0 : index
    %c0_29 = arith.constant 0 : index
    %c0_30 = arith.constant 0 : index
    %c0_31 = arith.constant 0 : index
    %16 = vector.load %arg1[%c0_28, %c0_29, %c0_30, %c0_31] : memref<1x16x16x32xf32, #tpu.memory_space<vmem>>, vector<1x16x16x32xf32>
    %17 = vector.shape_cast %16 : vector<1x16x16x32xf32> to vector<16x16x32xf32>
    %cst_32 = arith.constant 0.000000e+00 : f32
    %18 = vector.broadcast %cst_32 : f32 to vector<16x16x32xf32>
    %19 = arith.maximumf %17, %18 : vector<16x16x32xf32>
    %c1 = arith.constant 1 : index
    %c1_33 = arith.constant 1 : index
    %c0_34 = arith.constant 0 : index
    %20 = vector.load %arg12[%c1, %c1_33, %c0_34] : memref<18x18x32xf32, #tpu.memory_space<vmem>>, vector<16x16x32xf32>
    tpu.vector_store %arg12[%c1, %c1_33, %c0_34], %19 {strides = array<i32>} : memref<18x18x32xf32, #tpu.memory_space<vmem>>, vector<16x16x32xf32>,
    %cst_35 = arith.constant 0.000000e+00 : f32
    %21 = vector.broadcast %cst_35 : f32 to vector<16x16x32xf32>
    %c0_36 = arith.constant 0 : index
    %c0_37 = arith.constant 0 : index
    %c0_38 = arith.constant 0 : index
    %22 = vector.load %arg12[%c0_36, %c0_37, %c0_38] : memref<18x18x32xf32, #tpu.memory_space<vmem>>, vector<16x16x32xf32>
    %c0_39 = arith.constant 0 : index
    %c0_40 = arith.constant 0 : index
    %23 = vector.load %arg3[%c0_39, %c0_40] : memref<9x32xf32, #tpu.memory_space<vmem>>, vector<1x32xf32>
    %24 = vector.shape_cast %23 : vector<1x32xf32> to vector<32xf32>
    %25 = vector.shape_cast %24 : vector<32xf32> to vector<1x1x32xf32>
    %26 = vector.broadcast %25 : vector<1x1x32xf32> to vector<16x16x32xf32>
    %27 = arith.mulf %22, %26 : vector<16x16x32xf32>
    %28 = arith.addf %21, %27 : vector<16x16x32xf32>
    %c0_41 = arith.constant 0 : index
    %c1_42 = arith.constant 1 : index
    %c0_43 = arith.constant 0 : index
    %29 = vector.load %arg12[%c0_41, %c1_42, %c0_43] : memref<18x18x32xf32, #tpu.memory_space<vmem>>, vector<16x16x32xf32>
    %c1_44 = arith.constant 1 : index
    %c0_45 = arith.constant 0 : index
    %30 = vector.load %arg3[%c1_44, %c0_45] : memref<9x32xf32, #tpu.memory_space<vmem>>, vector<1x32xf32>
    %31 = vector.shape_cast %30 : vector<1x32xf32> to vector<32xf32>
    %32 = vector.shape_cast %31 : vector<32xf32> to vector<1x1x32xf32>
    %33 = vector.broadcast %32 : vector<1x1x32xf32> to vector<16x16x32xf32>
    %34 = arith.mulf %29, %33 : vector<16x16x32xf32>
    %35 = arith.addf %28, %34 : vector<16x16x32xf32>
    %c0_46 = arith.constant 0 : index
    %c2 = arith.constant 2 : index
    %c0_47 = arith.constant 0 : index
    %36 = vector.load %arg12[%c0_46, %c2, %c0_47] : memref<18x18x32xf32, #tpu.memory_space<vmem>>, vector<16x16x32xf32>
    %c2_48 = arith.constant 2 : index
    %c0_49 = arith.constant 0 : index
    %37 = vector.load %arg3[%c2_48, %c0_49] : memref<9x32xf32, #tpu.memory_space<vmem>>, vector<1x32xf32>
    %38 = vector.shape_cast %37 : vector<1x32xf32> to vector<32xf32>
    %39 = vector.shape_cast %38 : vector<32xf32> to vector<1x1x32xf32>
    %40 = vector.broadcast %39 : vector<1x1x32xf32> to vector<16x16x32xf32>
    %41 = arith.mulf %36, %40 : vector<16x16x32xf32>
    %42 = arith.addf %35, %41 : vector<16x16x32xf32>
    %c1_50 = arith.constant 1 : index
    %c0_51 = arith.constant 0 : index
    %c0_52 = arith.constant 0 : index
    %43 = vector.load %arg12[%c1_50, %c0_51, %c0_52] : memref<18x18x32xf32, #tpu.memory_space<vmem>>, vector<16x16x32xf32>
    %c3 = arith.constant 3 : index
    %c0_53 = arith.constant 0 : index
    %44 = vector.load %arg3[%c3, %c0_53] : memref<9x32xf32, #tpu.memory_space<vmem>>, vector<1x32xf32>
    %45 = vector.shape_cast %44 : vector<1x32xf32> to vector<32xf32>
    %46 = vector.shape_cast %45 : vector<32xf32> to vector<1x1x32xf32>
    %47 = vector.broadcast %46 : vector<1x1x32xf32> to vector<16x16x32xf32>
    %48 = arith.mulf %43, %47 : vector<16x16x32xf32>
    %49 = arith.addf %42, %48 : vector<16x16x32xf32>
    %c1_54 = arith.constant 1 : index
    %c1_55 = arith.constant 1 : index
    %c0_56 = arith.constant 0 : index
    %50 = vector.load %arg12[%c1_54, %c1_55, %c0_56] : memref<18x18x32xf32, #tpu.memory_space<vmem>>, vector<16x16x32xf32>
    %c4 = arith.constant 4 : index
    %c0_57 = arith.constant 0 : index
    %51 = vector.load %arg3[%c4, %c0_57] : memref<9x32xf32, #tpu.memory_space<vmem>>, vector<1x32xf32>
    %52 = vector.shape_cast %51 : vector<1x32xf32> to vector<32xf32>
    %53 = vector.shape_cast %52 : vector<32xf32> to vector<1x1x32xf32>
    %54 = vector.broadcast %53 : vector<1x1x32xf32> to vector<16x16x32xf32>
    %55 = arith.mulf %50, %54 : vector<16x16x32xf32>
    %56 = arith.addf %49, %55 : vector<16x16x32xf32>
    %c1_58 = arith.constant 1 : index
    %c2_59 = arith.constant 2 : index
    %c0_60 = arith.constant 0 : index
    %57 = vector.load %arg12[%c1_58, %c2_59, %c0_60] : memref<18x18x32xf32, #tpu.memory_space<vmem>>, vector<16x16x32xf32>
    %c5 = arith.constant 5 : index
    %c0_61 = arith.constant 0 : index
    %58 = vector.load %arg3[%c5, %c0_61] : memref<9x32xf32, #tpu.memory_space<vmem>>, vector<1x32xf32>
    %59 = vector.shape_cast %58 : vector<1x32xf32> to vector<32xf32>
    %60 = vector.shape_cast %59 : vector<32xf32> to vector<1x1x32xf32>
    %61 = vector.broadcast %60 : vector<1x1x32xf32> to vector<16x16x32xf32>
    %62 = arith.mulf %57, %61 : vector<16x16x32xf32>
    %63 = arith.addf %56, %62 : vector<16x16x32xf32>
    %c2_62 = arith.constant 2 : index
    %c0_63 = arith.constant 0 : index
    %c0_64 = arith.constant 0 : index
    %64 = vector.load %arg12[%c2_62, %c0_63, %c0_64] : memref<18x18x32xf32, #tpu.memory_space<vmem>>, vector<16x16x32xf32>
    %c6 = arith.constant 6 : index
    %c0_65 = arith.constant 0 : index
    %65 = vector.load %arg3[%c6, %c0_65] : memref<9x32xf32, #tpu.memory_space<vmem>>, vector<1x32xf32>
    %66 = vector.shape_cast %65 : vector<1x32xf32> to vector<32xf32>
    %67 = vector.shape_cast %66 : vector<32xf32> to vector<1x1x32xf32>
    %68 = vector.broadcast %67 : vector<1x1x32xf32> to vector<16x16x32xf32>
    %69 = arith.mulf %64, %68 : vector<16x16x32xf32>
    %70 = arith.addf %63, %69 : vector<16x16x32xf32>
    %c2_66 = arith.constant 2 : index
    %c1_67 = arith.constant 1 : index
    %c0_68 = arith.constant 0 : index
    %71 = vector.load %arg12[%c2_66, %c1_67, %c0_68] : memref<18x18x32xf32, #tpu.memory_space<vmem>>, vector<16x16x32xf32>
    %c7 = arith.constant 7 : index
    %c0_69 = arith.constant 0 : index
    %72 = vector.load %arg3[%c7, %c0_69] : memref<9x32xf32, #tpu.memory_space<vmem>>, vector<1x32xf32>
    %73 = vector.shape_cast %72 : vector<1x32xf32> to vector<32xf32>
    %74 = vector.shape_cast %73 : vector<32xf32> to vector<1x1x32xf32>
    %75 = vector.broadcast %74 : vector<1x1x32xf32> to vector<16x16x32xf32>
    %76 = arith.mulf %71, %75 : vector<16x16x32xf32>
    %77 = arith.addf %70, %76 : vector<16x16x32xf32>
    %c2_70 = arith.constant 2 : index
    %c2_71 = arith.constant 2 : index
    %c0_72 = arith.constant 0 : index
    %78 = vector.load %arg12[%c2_70, %c2_71, %c0_72] : memref<18x18x32xf32, #tpu.memory_space<vmem>>, vector<16x16x32xf32>
    %c8 = arith.constant 8 : index
    %c0_73 = arith.constant 0 : index
    %79 = vector.load %arg3[%c8, %c0_73] : memref<9x32xf32, #tpu.memory_space<vmem>>, vector<1x32xf32>
    %80 = vector.shape_cast %79 : vector<1x32xf32> to vector<32xf32>
    %81 = vector.shape_cast %80 : vector<32xf32> to vector<1x1x32xf32>
    %82 = vector.broadcast %81 : vector<1x1x32xf32> to vector<16x16x32xf32>
    %83 = arith.mulf %78, %82 : vector<16x16x32xf32>
    %84 = arith.addf %77, %83 : vector<16x16x32xf32>
    %85 = vector.shape_cast %84 : vector<16x16x32xf32> to vector<256x32xf32>
    %c0_74 = arith.constant 0 : index
    %c0_75 = arith.constant 0 : index
    %86 = vector.load %arg2[%c0_74, %c0_75] : memref<64x256xf32, #tpu.memory_space<vmem>>, vector<64x256xf32>
    %cst_76 = arith.constant dense<0.000000e+00> : vector<64x32xf32>
    %87 = tpu.matmul %86, %85, %cst_76 {dimension_numbers = #tpu.dot_dimension_numbers<[1], [0], [0], [1], [0, 0, 1, 1], [], []>} : vector<64x256xf32>, vector<256x32xf32>, vector<64x32xf32> -> vector<64x32xf32>
    %c0_77 = arith.constant 0 : index
    %c0_78 = arith.constant 0 : index
    %88 = vector.load %arg4[%c0_77, %c0_78] : memref<32x32xf32, #tpu.memory_space<vmem>>, vector<32x32xf32>
    %cst_79 = arith.constant dense<0.000000e+00> : vector<64x32xf32>
    %89 = tpu.matmul %87, %88, %cst_79 {dimension_numbers = #tpu.dot_dimension_numbers<[1], [0], [0], [1], [0, 0, 1, 1], [], []>} : vector<64x32xf32>, vector<32x32xf32>, vector<64x32xf32> -> vector<64x32xf32>
    %c0_80 = arith.constant 0 : index
    %c0_81 = arith.constant 0 : index
    %90 = vector.load %arg5[%c0_80, %c0_81] : memref<1x32xf32, #tpu.memory_space<vmem>>, vector<1x32xf32>
    %91 = vector.broadcast %90 : vector<1x32xf32> to vector<64x32xf32>
    %92 = arith.mulf %89, %91 : vector<64x32xf32>
    %c0_82 = arith.constant 0 : index
    %c0_83 = arith.constant 0 : index
    %93 = vector.load %arg6[%c0_82, %c0_83] : memref<1x32xf32, #tpu.memory_space<vmem>>, vector<1x32xf32>
    %94 = vector.broadcast %93 : vector<1x32xf32> to vector<64x32xf32>
    %95 = arith.addf %92, %94 : vector<64x32xf32>
    %cst_84 = arith.constant 0.000000e+00 : f32
    %96 = vector.broadcast %cst_84 : f32 to vector<64x32xf32>
    %97 = arith.maximumf %95, %96 : vector<64x32xf32>
    %98 = vector.shape_cast %97 : vector<64x32xf32> to vector<8x8x32xf32>
    %c1_85 = arith.constant 1 : index
    %c1_86 = arith.constant 1 : index
    %c0_87 = arith.constant 0 : index
    %99 = vector.load %arg13[%c1_85, %c1_86, %c0_87] : memref<10x10x32xf32, #tpu.memory_space<vmem>>, vector<8x8x32xf32>
    tpu.vector_store %arg13[%c1_85, %c1_86, %c0_87], %98 {strides = array<i32>} : memref<10x10x32xf32, #tpu.memory_space<vmem>>, vector<8x8x32xf32>,
    %cst_88 = arith.constant 0.000000e+00 : f32
    %100 = vector.broadcast %cst_88 : f32 to vector<8x8x32xf32>
    %c0_89 = arith.constant 0 : index
    %c0_90 = arith.constant 0 : index
    %c0_91 = arith.constant 0 : index
    %101 = vector.load %arg13[%c0_89, %c0_90, %c0_91] : memref<10x10x32xf32, #tpu.memory_space<vmem>>, vector<8x8x32xf32>
    %c0_92 = arith.constant 0 : index
    %c0_93 = arith.constant 0 : index
    %102 = vector.load %arg7[%c0_92, %c0_93] : memref<9x32xf32, #tpu.memory_space<vmem>>, vector<1x32xf32>
    %103 = vector.shape_cast %102 : vector<1x32xf32> to vector<32xf32>
    %104 = vector.shape_cast %103 : vector<32xf32> to vector<1x1x32xf32>
    %105 = vector.broadcast %104 : vector<1x1x32xf32> to vector<8x8x32xf32>
    %106 = arith.mulf %101, %105 : vector<8x8x32xf32>
    %107 = arith.addf %100, %106 : vector<8x8x32xf32>
    %c0_94 = arith.constant 0 : index
    %c1_95 = arith.constant 1 : index
    %c0_96 = arith.constant 0 : index
    %108 = vector.load %arg13[%c0_94, %c1_95, %c0_96] : memref<10x10x32xf32, #tpu.memory_space<vmem>>, vector<8x8x32xf32>
    %c1_97 = arith.constant 1 : index
    %c0_98 = arith.constant 0 : index
    %109 = vector.load %arg7[%c1_97, %c0_98] : memref<9x32xf32, #tpu.memory_space<vmem>>, vector<1x32xf32>
    %110 = vector.shape_cast %109 : vector<1x32xf32> to vector<32xf32>
    %111 = vector.shape_cast %110 : vector<32xf32> to vector<1x1x32xf32>
    %112 = vector.broadcast %111 : vector<1x1x32xf32> to vector<8x8x32xf32>
    %113 = arith.mulf %108, %112 : vector<8x8x32xf32>
    %114 = arith.addf %107, %113 : vector<8x8x32xf32>
    %c0_99 = arith.constant 0 : index
    %c2_100 = arith.constant 2 : index
    %c0_101 = arith.constant 0 : index
    %115 = vector.load %arg13[%c0_99, %c2_100, %c0_101] : memref<10x10x32xf32, #tpu.memory_space<vmem>>, vector<8x8x32xf32>
    %c2_102 = arith.constant 2 : index
    %c0_103 = arith.constant 0 : index
    %116 = vector.load %arg7[%c2_102, %c0_103] : memref<9x32xf32, #tpu.memory_space<vmem>>, vector<1x32xf32>
    %117 = vector.shape_cast %116 : vector<1x32xf32> to vector<32xf32>
    %118 = vector.shape_cast %117 : vector<32xf32> to vector<1x1x32xf32>
    %119 = vector.broadcast %118 : vector<1x1x32xf32> to vector<8x8x32xf32>
    %120 = arith.mulf %115, %119 : vector<8x8x32xf32>
    %121 = arith.addf %114, %120 : vector<8x8x32xf32>
    %c1_104 = arith.constant 1 : index
    %c0_105 = arith.constant 0 : index
    %c0_106 = arith.constant 0 : index
    %122 = vector.load %arg13[%c1_104, %c0_105, %c0_106] : memref<10x10x32xf32, #tpu.memory_space<vmem>>, vector<8x8x32xf32>
    %c3_107 = arith.constant 3 : index
    %c0_108 = arith.constant 0 : index
    %123 = vector.load %arg7[%c3_107, %c0_108] : memref<9x32xf32, #tpu.memory_space<vmem>>, vector<1x32xf32>
    %124 = vector.shape_cast %123 : vector<1x32xf32> to vector<32xf32>
    %125 = vector.shape_cast %124 : vector<32xf32> to vector<1x1x32xf32>
    %126 = vector.broadcast %125 : vector<1x1x32xf32> to vector<8x8x32xf32>
    %127 = arith.mulf %122, %126 : vector<8x8x32xf32>
    %128 = arith.addf %121, %127 : vector<8x8x32xf32>
    %c1_109 = arith.constant 1 : index
    %c1_110 = arith.constant 1 : index
    %c0_111 = arith.constant 0 : index
    %129 = vector.load %arg13[%c1_109, %c1_110, %c0_111] : memref<10x10x32xf32, #tpu.memory_space<vmem>>, vector<8x8x32xf32>
    %c4_112 = arith.constant 4 : index
    %c0_113 = arith.constant 0 : index
    %130 = vector.load %arg7[%c4_112, %c0_113] : memref<9x32xf32, #tpu.memory_space<vmem>>, vector<1x32xf32>
    %131 = vector.shape_cast %130 : vector<1x32xf32> to vector<32xf32>
    %132 = vector.shape_cast %131 : vector<32xf32> to vector<1x1x32xf32>
    %133 = vector.broadcast %132 : vector<1x1x32xf32> to vector<8x8x32xf32>
    %134 = arith.mulf %129, %133 : vector<8x8x32xf32>
    %135 = arith.addf %128, %134 : vector<8x8x32xf32>
    %c1_114 = arith.constant 1 : index
    %c2_115 = arith.constant 2 : index
    %c0_116 = arith.constant 0 : index
    %136 = vector.load %arg13[%c1_114, %c2_115, %c0_116] : memref<10x10x32xf32, #tpu.memory_space<vmem>>, vector<8x8x32xf32>
    %c5_117 = arith.constant 5 : index
    %c0_118 = arith.constant 0 : index
    %137 = vector.load %arg7[%c5_117, %c0_118] : memref<9x32xf32, #tpu.memory_space<vmem>>, vector<1x32xf32>
    %138 = vector.shape_cast %137 : vector<1x32xf32> to vector<32xf32>
    %139 = vector.shape_cast %138 : vector<32xf32> to vector<1x1x32xf32>
    %140 = vector.broadcast %139 : vector<1x1x32xf32> to vector<8x8x32xf32>
    %141 = arith.mulf %136, %140 : vector<8x8x32xf32>
    %142 = arith.addf %135, %141 : vector<8x8x32xf32>
    %c2_119 = arith.constant 2 : index
    %c0_120 = arith.constant 0 : index
    %c0_121 = arith.constant 0 : index
    %143 = vector.load %arg13[%c2_119, %c0_120, %c0_121] : memref<10x10x32xf32, #tpu.memory_space<vmem>>, vector<8x8x32xf32>
    %c6_122 = arith.constant 6 : index
    %c0_123 = arith.constant 0 : index
    %144 = vector.load %arg7[%c6_122, %c0_123] : memref<9x32xf32, #tpu.memory_space<vmem>>, vector<1x32xf32>
    %145 = vector.shape_cast %144 : vector<1x32xf32> to vector<32xf32>
    %146 = vector.shape_cast %145 : vector<32xf32> to vector<1x1x32xf32>
    %147 = vector.broadcast %146 : vector<1x1x32xf32> to vector<8x8x32xf32>
    %148 = arith.mulf %143, %147 : vector<8x8x32xf32>
    %149 = arith.addf %142, %148 : vector<8x8x32xf32>
    %c2_124 = arith.constant 2 : index
    %c1_125 = arith.constant 1 : index
    %c0_126 = arith.constant 0 : index
    %150 = vector.load %arg13[%c2_124, %c1_125, %c0_126] : memref<10x10x32xf32, #tpu.memory_space<vmem>>, vector<8x8x32xf32>
    %c7_127 = arith.constant 7 : index
    %c0_128 = arith.constant 0 : index
    %151 = vector.load %arg7[%c7_127, %c0_128] : memref<9x32xf32, #tpu.memory_space<vmem>>, vector<1x32xf32>
    %152 = vector.shape_cast %151 : vector<1x32xf32> to vector<32xf32>
    %153 = vector.shape_cast %152 : vector<32xf32> to vector<1x1x32xf32>
    %154 = vector.broadcast %153 : vector<1x1x32xf32> to vector<8x8x32xf32>
    %155 = arith.mulf %150, %154 : vector<8x8x32xf32>
    %156 = arith.addf %149, %155 : vector<8x8x32xf32>
    %c2_129 = arith.constant 2 : index
    %c2_130 = arith.constant 2 : index
    %c0_131 = arith.constant 0 : index
    %157 = vector.load %arg13[%c2_129, %c2_130, %c0_131] : memref<10x10x32xf32, #tpu.memory_space<vmem>>, vector<8x8x32xf32>
    %c8_132 = arith.constant 8 : index
    %c0_133 = arith.constant 0 : index
    %158 = vector.load %arg7[%c8_132, %c0_133] : memref<9x32xf32, #tpu.memory_space<vmem>>, vector<1x32xf32>
    %159 = vector.shape_cast %158 : vector<1x32xf32> to vector<32xf32>
    %160 = vector.shape_cast %159 : vector<32xf32> to vector<1x1x32xf32>
    %161 = vector.broadcast %160 : vector<1x1x32xf32> to vector<8x8x32xf32>
    %162 = arith.mulf %157, %161 : vector<8x8x32xf32>
    %163 = arith.addf %156, %162 : vector<8x8x32xf32>
    %164 = vector.shape_cast %163 : vector<8x8x32xf32> to vector<64x32xf32>
    %c0_134 = arith.constant 0 : index
    %c0_135 = arith.constant 0 : index
    %165 = vector.load %arg8[%c0_134, %c0_135] : memref<32x128xf32, #tpu.memory_space<vmem>>, vector<32x128xf32>
    %cst_136 = arith.constant dense<0.000000e+00> : vector<64x128xf32>
    %166 = tpu.matmul %164, %165, %cst_136 {dimension_numbers = #tpu.dot_dimension_numbers<[1], [0], [0], [1], [0, 0, 1, 1], [], []>} : vector<64x32xf32>, vector<32x128xf32>, vector<64x128xf32> -> vector<64x128xf32>
    %c0_137 = arith.constant 0 : index
    %c0_138 = arith.constant 0 : index
    %167 = vector.load %arg9[%c0_137, %c0_138] : memref<1x128xf32, #tpu.memory_space<vmem>>, vector<1x128xf32>
    %168 = vector.broadcast %167 : vector<1x128xf32> to vector<64x128xf32>
    %169 = arith.mulf %166, %168 : vector<64x128xf32>
    %c0_139 = arith.constant 0 : index
    %c0_140 = arith.constant 0 : index
    %170 = vector.load %arg10[%c0_139, %c0_140] : memref<1x128xf32, #tpu.memory_space<vmem>>, vector<1x128xf32>
    %171 = vector.broadcast %170 : vector<1x128xf32> to vector<64x128xf32>
    %172 = arith.addf %169, %171 : vector<64x128xf32>
    %173 = vector.shape_cast %172 : vector<64x128xf32> to vector<8x8x128xf32>
    %c0_141 = arith.constant 0 : index
    %c0_142 = arith.constant 0 : index
    %c0_143 = arith.constant 0 : index
    %c0_144 = arith.constant 0 : index
    %174 = vector.load %arg11[%c0_141, %c0_142, %c0_143, %c0_144] : memref<1x8x8x128xf32, #tpu.memory_space<vmem>>, vector<1x8x8x128xf32>
    %175 = vector.shape_cast %174 : vector<1x8x8x128xf32> to vector<8x8x128xf32>
    %176 = vector.shape_cast %173 : vector<8x8x128xf32> to vector<1x8x8x128xf32>
    tpu.vector_store %arg11[%c0_141, %c0_142, %c0_143, %c0_144], %176 {strides = array<i32>} : memref<1x8x8x128xf32, #tpu.memory_space<vmem>>, vector<1x8x8x128xf32>,
    return
  }
  func.func @transform_0(%arg0: i32) -> (i32, i32, i32, i32) {
    %c0_i32 = arith.constant 0 : i32
    %c0_i32_0 = arith.constant 0 : i32
    %c0_i32_1 = arith.constant 0 : i32
    %c0_i32_2 = arith.constant 0 : i32
    return %arg0, %c0_i32, %c0_i32_0, %c0_i32_1 : i32, i32, i32, i32
  }
  func.func @transform_1(%arg0: i32) -> (i32, i32) {
    %c0_i32 = arith.constant 0 : i32
    %c0_i32_0 = arith.constant 0 : i32
    %c0_i32_1 = arith.constant 0 : i32
    return %c0_i32, %c0_i32_0 : i32, i32
  }
  func.func @transform_2(%arg0: i32) -> (i32, i32) {
    %c0_i32 = arith.constant 0 : i32
    %c0_i32_0 = arith.constant 0 : i32
    %c0_i32_1 = arith.constant 0 : i32
    return %c0_i32, %c0_i32_0 : i32, i32
  }
  func.func @transform_3(%arg0: i32) -> (i32, i32) {
    %c0_i32 = arith.constant 0 : i32
    %c0_i32_0 = arith.constant 0 : i32
    %c0_i32_1 = arith.constant 0 : i32
    return %c0_i32, %c0_i32_0 : i32, i32
  }
  func.func @transform_4(%arg0: i32) -> (i32, i32) {
    %c0_i32 = arith.constant 0 : i32
    %c0_i32_0 = arith.constant 0 : i32
    %c0_i32_1 = arith.constant 0 : i32
    return %c0_i32, %c0_i32_0 : i32, i32
  }
  func.func @transform_5(%arg0: i32) -> (i32, i32) {
    %c0_i32 = arith.constant 0 : i32
    %c0_i32_0 = arith.constant 0 : i32
    %c0_i32_1 = arith.constant 0 : i32
    return %c0_i32, %c0_i32_0 : i32, i32
  }
  func.func @transform_6(%arg0: i32) -> (i32, i32) {
    %c0_i32 = arith.constant 0 : i32
    %c0_i32_0 = arith.constant 0 : i32
    %c0_i32_1 = arith.constant 0 : i32
    return %c0_i32, %c0_i32_0 : i32, i32
  }
  func.func @transform_7(%arg0: i32) -> (i32, i32) {
    %c0_i32 = arith.constant 0 : i32
    %c0_i32_0 = arith.constant 0 : i32
    %c0_i32_1 = arith.constant 0 : i32
    return %c0_i32, %c0_i32_0 : i32, i32
  }
  func.func @transform_8(%arg0: i32) -> (i32, i32) {
    %c0_i32 = arith.constant 0 : i32
    %c0_i32_0 = arith.constant 0 : i32
    %c0_i32_1 = arith.constant 0 : i32
    return %c0_i32, %c0_i32_0 : i32, i32
  }
  func.func @transform_9(%arg0: i32) -> (i32, i32) {
    %c0_i32 = arith.constant 0 : i32
    %c0_i32_0 = arith.constant 0 : i32
    %c0_i32_1 = arith.constant 0 : i32
    return %c0_i32, %c0_i32_0 : i32, i32
  }
  func.func @transform_10(%arg0: i32) -> (i32, i32, i32, i32) {
    %c0_i32 = arith.constant 0 : i32
    %c0_i32_0 = arith.constant 0 : i32
    %c0_i32_1 = arith.constant 0 : i32
    %c0_i32_2 = arith.constant 0 : i32
    return %arg0, %c0_i32, %c0_i32_0, %c0_i32_1 : i32, i32, i32, i32
  }
}

</mosaic_0001>

<bundles_post_ra>
// kernel: sepconv_forward.1
= control target key start
LH: loop header
LB: loop body
LE: loop exit
PB: predicated region body
PF: predicated region fallthrough
CT: control target
= control target key end

     0   :  { %s4101_s0 = inlined_call_operand.hbm [shape: f32[2,16,16,32], index: 0, kind: input, shape index: {}]   ;;  %s4102_s1 = inlined_call_operand.hbm [shape: f32[64,256], index: 1, kind: input, shape index: {}]   ;;  %s4103_s2 = inlined_call_operand.vmem [shape: f32[9,32], index: 2, kind: input, shape index: {}]   ;;  %s4104_s3 = inlined_call_operand.vmem [shape: f32[32,32], index: 3, kind: input, shape index: {}]   ;;  %s4105_s4 = inlined_call_operand.vmem [shape: f32[1,32], index: 4, kind: input, shape index: {}]   ;;  %s4106_s5 = inlined_call_operand.vmem [shape: f32[1,32], index: 5, kind: input, shape index: {}]   ;;  %s4107_s6 = inlined_call_operand.vmem [shape: f32[9,32], index: 6, kind: input, shape index: {}]   ;;  %s4108_s7 = inlined_call_operand.vmem [shape: f32[32,128], index: 7, kind: input, shape index: {}]   ;;  %s4109_s8 = inlined_call_operand.vmem [shape: f32[1,128], index: 8, kind: input, shape index: {}]   ;;  %s4110_s9 = inlined_call_operand.vmem [shape: f32[1,128], index: 9, kind: input, shape index: {}]   ;;  %s4111_s10 = inlined_call_operand.vmem [shape: f32[2,8,8,128], index: 10, kind: output, shape index: {}]  }
   0x1   :  { %4117 = sst [smem:[#allocation11_spill]] %s4111_s10 }
   0x2   :  { %15 = vsyncpa [#allocation5], 0 }
   0x3   :  { %17 = vsyncpa [#allocation5 + $0x1], 0 }
   0x4   :  { %18 = vsyncpa [#allocation7], 0  ;;  %s2730_s13 = smov 0   ;;  %s2732_s14 = smov 0  }
   0x5   :  { %s2734_s15 = smov 0   ;;  %s2736_s16 = smov 0  }
   0x6 LB: > { %s2749_s17 = sadd.s32 4294967295, %s2666_s16   ;;  %p44_p0 = scmp.ne.s32.totalorder %s2658_s14, %s2654_s13  ;;  %s2666_s16 = sphi %s2736_s16, %s4128_s16   ;;  %s2662_s15 = sphi %s2734_s15, %s4131_s15   ;;  %s2658_s14 = sphi %s2732_s14, %s4130_s14   ;;  %s2654_s13 = sphi %s2730_s13, %s4129_s13  }
   0x7   : > { %p4112_p1 = scmp.eq.s32.totalorder %s2749_s17, 0  ;;  %p2285_p2 = scmp.ge.s32.totalorder %s2666_s16, 1 }
   0x8   : > { %p270_p3 = scmp.lt.s32.totalorder %s2666_s16, 3  ;;  %s2668_s20 = smov [#allocation6]  }
   0x9   : > { %p2757_p4 = por %p4112_p1, %p44_p0  ;;  %s282_s21 = sshll.u32 %s2668_s20, 4  ;;  %s283_s21 = int_to_ptr.vmem [resolvable:$true] %s282_s21 }
   0xa   : > { %p2761_p5 = pnand %p2285_p2, %p270_p3  ;;  %s2774_s23 = sadd.s32 1, %s2666_s16  }
   0xb   : > { %s4118_s18 = scalar_select %p2757_p4, 1, 0 }
   0xc   : > { %s4119_s19 = scalar_select %p2761_p5, 1, 0 }
   0xd   : > { %p2512_p6 = pneg %p2761_p5  ;;  %4121 = sst [smem:[#allocation10_spill]] %s2774_s23 }
   0xe   : > { %s31_s24 = sadd.s32 1, %s2662_s15  ;;  %s28_s25 = ssub.s32 %s2666_s16, %s2774_s23 }
   0xf   : > { %p2769_p7 = pnand %p2512_p6, %p4112_p1  ;;  %s2570_s28 = scalar_lea.hbm %s4102_s1, 2048 }
  0x10   : > { %p2571_p8 = scmp.ne.s32.totalorder %s4102_s1, %s2570_s28  ;;  %p2577_p12 = scmp.lt.u32.totalorder %s2570_s28, %s4102_s1 }
  0x11   : > { %p2572_p9 = pneg %p2769_p7 }
  0x13   : > { %p2573_p10 = pnand %p2572_p9, %p2571_p8 }
  0x15   : > { %p2574_p11 = pneg %p2573_p10 }
  0x17   : > { %p2579_p13 = pnand %p2577_p12, %p2574_p11 }
  0x19   : > { %2582 = shalt.err (!%p2579_p13)
}
  0x1a   : > { %s2583_s13 = scalar_lea.vmem %s283_s21, 2048  ;;  %p2591_p6 = scmp.lt.s32.totalorder %s283_s21, %s283_s21 }
  0x1b   : > { %p2584_p0 = scmp.ne.s32.totalorder %s283_s21, %s2583_s13  ;;  %p2592_p1 = scmp.lt.s32.totalorder %s2583_s13, %s2583_s13 }
  0x1d   : > { %p2586_p2 = pnand %p2584_p0, %p2572_p9  ;;  %p2593_p4 = por %p2592_p1, %p2591_p6 }
  0x1f   : > { %p2587_p3 = pneg %p2586_p2 }
  0x21   : > { %p2594_p5 = pnand %p2593_p4, %p2587_p3 }
  0x23   : > { %2597 = shalt.err (!%p2594_p5)
}
  0x24   : > { %s2669_s20 = smov 256   ;;  %s2670_s26 = smov 16  }
  0x25   : > { %2515 = dma.hbm_to_vmem [thread:$0]  (!%p2769_p7), %s4102_s1, 2048, %s283_s21, [#allocation7], %s2669_s20, %s2669_s20, %s2670_s26  }
  0x26   : > { %p29_p8 = scmp.eq.s32.totalorder %s28_s25, 0  ;;  %p38_p9 = scmp.ne.s32.totalorder %s2662_s15, %s2658_s14 }
  0x27   : > { %p39_p1 = scmp.eq.s32.totalorder %s2666_s16, 0  ;;  %p2521_p4 = scmp.lt.s32.totalorder %s2666_s16, 2 }
  0x28   : > { %s2800_s29 = scalar_select %p29_p8, %s2662_s15, %s31_s24  }
  0x29   : > { %p40_p5 = por %p39_p1, %p38_p9  ;;  %s320_s30 = sand.u32 1, %s2662_s15  }
  0x2a   : > { %s2288_s11 = sshll.u32 %s320_s30, 8  ;;  %s2336_s12 = sshll.u32 %s2666_s16, 12 }
  0x2b   : > { %s2807_s10 = scalar_lea.hbm %s4101_s0, %s2336_s12  ;;  %s324_s21 = scalar_lea.vmem [#allocation4], %s2288_s11 }
  0x2c   : > { %s331_s22 = sshll.u32 %s324_s21, 4  ;;  %p2811_p7 = pnand %p2521_p4, %p40_p5  ;;  %s2809_s22 = int_to_ptr.vmem [resolvable:$true] %s331_s22 }
  0x2d   : > { %s2815_s16 = scalar_lea.sflag [#allocation5], %s320_s30  ;;  %s2598_s25 = scalar_lea.hbm %s2807_s10, 4096 }
  0x2e   : > { %p2599_p10 = scmp.ne.s32.totalorder %s2807_s10, %s2598_s25  ;;  %p2600_p11 = pneg %p2811_p7 }
  0x2f   : > { %s2603_s26 = scalar_lea.hbm %s4101_s0, 8192  ;;  %p2604_p0 = scmp.lt.u32.totalorder %s2807_s10, %s4101_s0 }
  0x30   : > { %p2601_p12 = pnand %p2600_p11, %p2599_p10  ;;  %p2605_p2 = scmp.lt.u32.totalorder %s2603_s26, %s2598_s25 }
  0x31   : > { %p2607_p6 = scmp.lt.u32.totalorder %s2598_s25, %s2807_s10 }
  0x32   : > { %p2602_p13 = pneg %p2601_p12  ;;  %p2606_p3 = por %p2605_p2, %p2604_p0 }
  0x34   : > { %p2608_p8 = por %p2607_p6, %p2606_p3 }
  0x36   : > { %p2609_p9 = pnand %p2608_p8, %p2602_p13 }
  0x38   : > { %2612 = shalt.err (!%p2609_p9)
}
  0x39   : > { %s2613_s30 = scalar_lea.vmem %s2809_s22, 4096  ;;  %s2671_s11 = smov [#allocation4]  }
  0x3a   : > { %p2614_p1 = scmp.ne.s32.totalorder %s2809_s22, %s2613_s30  ;;  %s2618_s12 = sshll.u32 %s2671_s11, 4  ;;  %s2619_s12 = int_to_ptr.vmem [resolvable:$false] %s2618_s12 }
  0x3b   : > { %s2620_s13 = scalar_lea.vmem %s2619_s12, 8192  ;;  %p2621_p10 = scmp.lt.s32.totalorder %s2809_s22, %s2619_s12 }
  0x3c   : > { %p2616_p4 = pnand %p2614_p1, %p2600_p11  ;;  %p2622_p12 = scmp.lt.s32.totalorder %s2620_s13, %s2613_s30 }
  0x3e   : > { %p2617_p5 = pneg %p2616_p4  ;;  %p2623_p0 = por %p2622_p12, %p2621_p10 }
  0x40   : > { %p2624_p2 = pnand %p2623_p0, %p2617_p5 }
  0x42   : > { %2627 = shalt.err (!%p2624_p2)
}
  0x43   : > { %s2672_s21 = smov 128   ;;  %s2673_s25 = smov 8  }
  0x44   : > { %2519 = dma.hbm_to_vmem [thread:$0]  (!%p2811_p7), %s2807_s10, 4096, %s2809_s22, %s2815_s16, %s2672_s21, %s2672_s21, %s2673_s25  }
  0x45   : > { %p4123_p11 = scmp.ne.s32.totalorder %s4119_s19, 0 }
  0x46   : > { %s345_s23 = sand.u32 (!%p4123_p11), 1, %s2658_s14   ;;  %p4124_p13 = scmp.ne.s32.totalorder (!%p4123_p11), %s4118_s18, 0 }
  0x47   : > { %343 = sbr.rel (%p4123_p11) target bundleno = 988 (0x3dc), region = 60  ;;  %s2292_s20 = sshll.u32 (!%p4123_p11), %s345_s23, 8 }
  0x48   : > { %s346_s26 = scalar_lea.sflag (!%p4123_p11), [#allocation5], %s345_s23  ;;  %s2846_s27 = scalar_lea.vmem (!%p4123_p11), [#allocation4], %s2292_s20 }
  0x4e   : > { %2645 = dma.done.wait (%p4124_p13), %s346_s26, 4096  }
  0x4f   : > { %2647 = vsyncadd (%p4124_p13), %s346_s26, 4294963200  ;;  %p4125_p3 = scmp.eq.s32.totalorder %s2749_s17, 0 }
  0x51   : > { %2649 = dma.done.wait (%p4125_p3), [#allocation7], 2048   ;;  %p4126_p7 = pmov %p4125_p3 }
  0x52   : > { %vm395_vm0 = vcmask 261120   ;;  %vm404_vm1 = vcmask 253952   ;;  %vm398_vm2 = vcmask 254976   ;;  %v2674_v0 = vmov 0.0   ;;  %v480_v1 = vld [vmem:[%s2846_s27 + $0x70] sm:$0xff]  ;;  %v481_v2 = vld [vmem:[%s2846_s27 + $0x78] sm:$0xff] }
  0x53   : > { %2651 = vsyncadd (%p4126_p7), [#allocation7], 4294965248  ;;  %413 = vst.msk [vmem:[#allocation2 + $0xc0] sm:$0x1] %vm404_vm1, %v2674_v0  ;;  %v482_v3 = vld [vmem:[%s2846_s27 + $0x80] sm:$0xff]  ;;  %v483_v4 = vld [vmem:[%s2846_s27 + $0x88] sm:$0xff] }
  0x54   : > { %414 = vst.msk [vmem:[#allocation2 + $0xd8] sm:$0x1] %vm404_vm1, %v2674_v0  ;;  %415 = vst.msk [vmem:[#allocation2 + $0xf0] sm:$0x1] %vm404_vm1, %v2674_v0  ;;  %v484_v5 = vld [vmem:[%s2846_s27 + $0x90] sm:$0xff]  ;;  %v485_v6 = vld [vmem:[%s2846_s27 + $0x98] sm:$0xff] }
  0x55   : > { %431 = vst.msk [vmem:[#allocation2 + $0xd1] sm:$0x1] %vm404_vm1, %v2674_v0  ;;  %432 = vst.msk [vmem:[#allocation2 + $0xe9] sm:$0x1] %vm404_vm1, %v2674_v0  ;;  %v512_v7 = vmax.f32 %v480_v1, 0.0  ;;  %v513_v8 = vmax.f32 %v481_v2, 0.0 }
  0x56   : > { %433 = vst.msk [vmem:[#allocation2 + $0x101] sm:$0x1] %vm404_vm1, %v2674_v0  ;;  %406 = vst.msk [vmem:[#allocation2 + $0x18] sm:$0x1] %vm404_vm1, %v2674_v0  ;;  %v514_v9 = vmax.f32 %v482_v3, 0.0  ;;  %v515_v10 = vmax.f32 %v483_v4, 0.0 }
  0x57   : > { %396 = vst.msk [vmem:[#allocation2] sm:$0xff] %vm395_vm0, %v2674_v0  ;;  %397 = vst.msk [vmem:[#allocation2 + $0x8] sm:$0xff] %vm395_vm0, %v2674_v0  ;;  %v516_v11 = vmax.f32 %v484_v5, 0.0  ;;  %v517_v12 = vmax.f32 %v485_v6, 0.0  ;;  %v466_v13 = vld [vmem:[%s2846_s27] sm:$0xff]  ;;  %v467_v17 = vld [vmem:[%s2846_s27 + $0x8] sm:$0xff] }
  0x58   : > { %401 = vst.msk [vmem:[#allocation2 + $0x198] sm:$0xff] %vm395_vm0, %v2674_v0  ;;  %402 = vst.msk [vmem:[#allocation2 + $0x1a0] sm:$0xff] %vm395_vm0, %v2674_v0  ;;  %v3004_v14 = vld [vmem:[%s4103_s2] ss:$0 sm:$0xff]  ;;  %v3009_v15 = vld [vmem:[%s4103_s2 + $0x1] ss:$0 sm:$0xff] }
  0x59   : > { %407 = vst.msk [vmem:[#allocation2 + $0x30] sm:$0x1] %vm404_vm1, %v2674_v0  ;;  %408 = vst.msk [vmem:[#allocation2 + $0x48] sm:$0x1] %vm404_vm1, %v2674_v0  ;;  %v3014_v16 = vld [vmem:[%s4103_s2 + $0x2] ss:$0 sm:$0xff] }
  0x5a   : > { %409 = vst.msk [vmem:[#allocation2 + $0x60] sm:$0x1] %vm404_vm1, %v2674_v0  ;;  %410 = vst.msk [vmem:[#allocation2 + $0x78] sm:$0x1] %vm404_vm1, %v2674_v0  ;;  %v498_v18 = vmax.f32 %v466_v13, 0.0  ;;  %v468_v19 = vld [vmem:[%s2846_s27 + $0x10] sm:$0xff] }
  0x5b   : > { %411 = vst.msk [vmem:[#allocation2 + $0x90] sm:$0x1] %vm404_vm1, %v2674_v0  ;;  %412 = vst.msk [vmem:[#allocation2 + $0xa8] sm:$0x1] %vm404_vm1, %v2674_v0  ;;  %v469_v20 = vld [vmem:[%s2846_s27 + $0x18] sm:$0xff]  ;;  %v499_v21 = vmax.f32 %v467_v17, 0.0 }
  0x5c   : > { %416 = vst.msk [vmem:[#allocation2 + $0x108] sm:$0x1] %vm404_vm1, %v2674_v0  ;;  %417 = vst.msk [vmem:[#allocation2 + $0x120] sm:$0x1] %vm404_vm1, %v2674_v0  ;;  %v500_v23 = vmax.f32 %v468_v19, 0.0  ;;  %v501_v24 = vmax.f32 %v469_v20, 0.0 }
  0x5d   : > { %418 = vst.msk [vmem:[#allocation2 + $0x138] sm:$0x1] %vm404_vm1, %v2674_v0  ;;  %419 = vst.msk [vmem:[#allocation2 + $0x150] sm:$0x1] %vm404_vm1, %v2674_v0  ;;  %v3024_v29 = vld [vmem:[%s4103_s2 + $0x3] ss:$0 sm:$0xff] }
  0x5e   : > { %420 = vst.msk [vmem:[#allocation2 + $0x168] sm:$0x1] %vm404_vm1, %v2674_v0  ;;  %421 = vst.msk [vmem:[#allocation2 + $0x180] sm:$0x1] %vm404_vm1, %v2674_v0  ;;  %v564_v25 = vld [vmem:[#allocation2 + $0x8] sm:$0xff]  ;;  %v486_v36 = vld [vmem:[%s2846_s27 + $0xa0] sm:$0xff] }
  0x5f   : > { %424 = vst.msk [vmem:[#allocation2 + $0x29] sm:$0x1] %vm404_vm1, %v2674_v0  ;;  %425 = vst.msk [vmem:[#allocation2 + $0x41] sm:$0x1] %vm404_vm1, %v2674_v0  ;;  %v664_v27 = vld [vmem:[#allocation2 + $0x1] sm:$0xff]  ;;  %v601_v31 = vmul.f32 %v3004_v14, %v564_v25  ;;  %v487_v40 = vld [vmem:[%s2846_s27 + $0xa8] sm:$0xff] }
  0x60   : > { %426 = vst.msk [vmem:[#allocation2 + $0x59] sm:$0x1] %vm404_vm1, %v2674_v0  ;;  %427 = vst.msk [vmem:[#allocation2 + $0x71] sm:$0x1] %vm404_vm1, %v2674_v0  ;;  %v3029_v30 = vld [vmem:[%s4103_s2 + $0x4] ss:$0 sm:$0xff]  ;;  %v701_v32 = vmul.f32 %v3009_v15, %v664_v27 }
  0x61   : > { %428 = vst.msk [vmem:[#allocation2 + $0x89] sm:$0x1] %vm404_vm1, %v2674_v0  ;;  %429 = vst.msk [vmem:[#allocation2 + $0xa1] sm:$0x1] %vm404_vm1, %v2674_v0  ;;  %v765_v34 = vld [vmem:[#allocation2 + $0x2] sm:$0xff]  ;;  %v518_v41 = vmax.f32 %v486_v36, 0.0 }
  0x62   : > { %430 = vst.msk [vmem:[#allocation2 + $0xb9] sm:$0x1] %vm404_vm1, %v2674_v0  ;;  %434 = vst.msk [vmem:[#allocation2 + $0x119] sm:$0x1] %vm404_vm1, %v2674_v0  ;;  %v3039_v37 = vld [vmem:[%s4103_s2 + $0x5] ss:$0 sm:$0xff]  ;;  %v802_v38 = vmul.f32 %v3014_v16, %v765_v34 }
  0x63   : > { %435 = vst.msk [vmem:[#allocation2 + $0x131] sm:$0x1] %vm404_vm1, %v2674_v0  ;;  %436 = vst.msk [vmem:[#allocation2 + $0x149] sm:$0x1] %vm404_vm1, %v2674_v0  ;;  %v470_v42 = vld [vmem:[%s2846_s27 + $0x20] sm:$0xff]  ;;  %v471_v43 = vld [vmem:[%s2846_s27 + $0x28] sm:$0xff] }
  0x64   : > { %437 = vst.msk [vmem:[#allocation2 + $0x161] sm:$0x1] %vm404_vm1, %v2674_v0  ;;  %438 = vst.msk [vmem:[#allocation2 + $0x179] sm:$0x1] %vm404_vm1, %v2674_v0  ;;  %v3051_v47 = vld [vmem:[%s4103_s2 + $0x6] ss:$0 sm:$0xff] }
  0x65   : > { %439 = vst.msk [vmem:[#allocation2 + $0x191] sm:$0x1] %vm404_vm1, %v2674_v0  ;;  %447 = vst.msk [vmem:[#allocation3 + $0x10] sm:$0x1] %vm404_vm1, %v2674_v0  ;;  %v3056_v48 = vld [vmem:[%s4103_s2 + $0x7] ss:$0 sm:$0xff] }
  0x66   : > { %441 = vst.msk [vmem:[#allocation3] sm:$0xff] %vm395_vm0, %v2674_v0  ;;  %444 = vst.msk [vmem:[#allocation3 + $0x90] sm:$0xff] %vm395_vm0, %v2674_v0  ;;  %v519_v51 = vmax.f32 %v487_v40, 0.0  ;;  %v502_v52 = vmax.f32 %v470_v42, 0.0  ;;  %v3064_v59 = vld [vmem:[%s4103_s2 + $0x8] ss:$0 sm:$0xff] }
  0x67   : > { %448 = vst.msk [vmem:[#allocation3 + $0x20] sm:$0x1] %vm404_vm1, %v2674_v0  ;;  %449 = vst.msk [vmem:[#allocation3 + $0x30] sm:$0x1] %vm404_vm1, %v2674_v0  ;;  %v503_v60 = vmax.f32 %v471_v43, 0.0  ;;  %p390_p6 = scmp.lt.s32.totalorder %s2749_s17, 1 }
  0x68   : > { %450 = vst.msk [vmem:[#allocation3 + $0x40] sm:$0x1] %vm404_vm1, %v2674_v0  ;;  %451 = vst.msk [vmem:[#allocation3 + $0x50] sm:$0x1] %vm404_vm1, %v2674_v0  ;;  %s4127_s20 = sld [smem:[#allocation11_spill]] }
  0x69   : > { %452 = vst.msk [vmem:[#allocation3 + $0x60] sm:$0x1] %vm404_vm1, %v2674_v0  ;;  %453 = vst.msk [vmem:[#allocation3 + $0x70] sm:$0x1] %vm404_vm1, %v2674_v0  ;;  %s4133_s17 = smov (!%p390_p6, %s2749_s17), 1 }
  0x6a   : > { %454 = vst.msk [vmem:[#allocation3 + $0x80] sm:$0x1] %vm404_vm1, %v2674_v0  ;;  %457 = vst.msk [vmem:[#allocation3 + $0x19] sm:$0x1] %vm404_vm1, %v2674_v0  ;;  %s2337_s12 = sshll.u32 %s4133_s17, 6 }
  0x6b   : > { %458 = vst.msk [vmem:[#allocation3 + $0x29] sm:$0x1] %vm404_vm1, %v2674_v0  ;;  %459 = vst.msk [vmem:[#allocation3 + $0x39] sm:$0x1] %vm404_vm1, %v2674_v0 }
  0x6c   : > { %460 = vst.msk [vmem:[#allocation3 + $0x49] sm:$0x1] %vm404_vm1, %v2674_v0  ;;  %461 = vst.msk [vmem:[#allocation3 + $0x59] sm:$0x1] %vm404_vm1, %v2674_v0 }
  0x6d   : > { %462 = vst.msk [vmem:[#allocation3 + $0x69] sm:$0x1] %vm404_vm1, %v2674_v0  ;;  %463 = vst.msk [vmem:[#allocation3 + $0x79] sm:$0x1] %vm404_vm1, %v2674_v0 }
  0x6e   : > { %464 = vst.msk [vmem:[#allocation3 + $0x89] sm:$0x1] %vm404_vm1, %v2674_v0  ;;  %405 = vst.msk [vmem:[#allocation2] sm:$0x1] %vm404_vm1, %v2674_v0  ;;  %s394_s26 = scalar_lea.vmem %s4127_s20, %s2337_s12 }
  0x6f   : > { %399 = vst.msk [vmem:[#allocation2 + $0x10] sm:$0x3] %vm398_vm2, %v2674_v0  ;;  %403 = vst.msk [vmem:[#allocation2 + $0x1a8] sm:$0x3] %vm398_vm2, %v2674_v0 }
  0x70   : > { %442 = vst.msk [vmem:[#allocation3 + $0x8] sm:$0x3] %vm398_vm2, %v2674_v0  ;;  %445 = vst.msk [vmem:[#allocation3 + $0x98] sm:$0x3] %vm398_vm2, %v2674_v0 }
  0x71   : > { %423 = vst.msk [vmem:[#allocation2 + $0x11] sm:$0x1] %vm404_vm1, %v2674_v0  ;;  %422 = vst.msk [vmem:[#allocation2 + $0x198] sm:$0x1] %vm404_vm1, %v2674_v0 }
  0x72   : > { %446 = vst.msk [vmem:[#allocation3] sm:$0x1] %vm404_vm1, %v2674_v0  ;;  %455 = vst.msk [vmem:[#allocation3 + $0x90] sm:$0x1] %vm404_vm1, %v2674_v0 }
  0x73   : > { %440 = vst.msk [vmem:[#allocation2 + $0x1a9] sm:$0x1] %vm404_vm1, %v2674_v0  ;;  %456 = vst.msk [vmem:[#allocation3 + $0x9] sm:$0x1] %vm404_vm1, %v2674_v0 }
  0x74   : > { %465 = vst.msk [vmem:[#allocation3 + $0x99] sm:$0x1] %vm404_vm1, %v2674_v0 }
  0x75   : > { %545 = vst.msk [vmem:[#allocation2 + $0xc1] sm:$0xff] %vm395_vm0, %v512_v7  ;;  %546 = vst.msk [vmem:[#allocation2 + $0xc9] sm:$0xff] %vm395_vm0, %v513_v8  ;;  %v563_v22 = vld [vmem:[#allocation2] sm:$0xff] }
  0x76   : > { %547 = vst.msk [vmem:[#allocation2 + $0xd9] sm:$0xff] %vm395_vm0, %v514_v9  ;;  %548 = vst.msk [vmem:[#allocation2 + $0xe1] sm:$0xff] %vm395_vm0, %v515_v10  ;;  %v600_v26 = vmul.f32 %v3004_v14, %v563_v22  ;;  %v665_v28 = vld [vmem:[#allocation2 + $0x9] sm:$0xff] }
  0x77   : > { %549 = vst.msk [vmem:[#allocation2 + $0xf1] sm:$0xff] %vm395_vm0, %v516_v11  ;;  %550 = vst.msk [vmem:[#allocation2 + $0xf9] sm:$0xff] %vm395_vm0, %v517_v12  ;;  %v702_v33 = vmul.f32 %v3009_v15, %v665_v28 }
  0x78   : > { %531 = vst.msk [vmem:[#allocation2 + $0x19] sm:$0xff] %vm395_vm0, %v498_v18  ;;  %532 = vst.msk [vmem:[#allocation2 + $0x21] sm:$0xff] %vm395_vm0, %v499_v21  ;;  %v766_v35 = vld [vmem:[#allocation2 + $0xa] sm:$0xff]  ;;  %v733_v49 = vadd.f32 %v701_v32, %v600_v26 }
  0x79   : > { %533 = vst.msk [vmem:[#allocation2 + $0x31] sm:$0xff] %vm395_vm0, %v500_v23  ;;  %534 = vst.msk [vmem:[#allocation2 + $0x39] sm:$0xff] %vm395_vm0, %v501_v24  ;;  %v803_v39 = vmul.f32 %v3014_v16, %v766_v35  ;;  %v734_v50 = vadd.f32 %v702_v33, %v601_v31 }
  0x7a   : > { %551 = vst.msk [vmem:[#allocation2 + $0x109] sm:$0xff] %vm395_vm0, %v518_v41  ;;  %v834_v3 = vadd.f32 %v802_v38, %v733_v49  ;;  %552 = vst.msk [vmem:[#allocation2 + $0x111] sm:$0xff] %vm395_vm0, %v519_v51 }
  0x7b   : > { %535 = vst.msk [vmem:[#allocation2 + $0x49] sm:$0xff] %vm395_vm0, %v502_v52  ;;  %536 = vst.msk [vmem:[#allocation2 + $0x51] sm:$0xff] %vm395_vm0, %v503_v60  ;;  %v835_v38 = vadd.f32 %v803_v39, %v734_v50 }
  0x7c   : > { %v579_v44 = vld [vmem:[#allocation2 + $0xc0] sm:$0xff]  ;;  %v580_v45 = vld [vmem:[#allocation2 + $0xc8] sm:$0xff] }
  0x7d   : > { %v680_v46 = vld [vmem:[#allocation2 + $0xc1] sm:$0xff]  ;;  %v616_v53 = vmul.f32 %v3004_v14, %v579_v44  ;;  %v617_v54 = vmul.f32 %v3004_v14, %v580_v45  ;;  %v681_v55 = vld [vmem:[#allocation2 + $0xc9] sm:$0xff]  ;;  %v3070_v0 = vld [vmem:[#allocation2 + $0xd8] sm:$0xff] }
  0x7e   : > { %v717_v56 = vmul.f32 %v3009_v15, %v680_v46  ;;  %v781_v57 = vld [vmem:[#allocation2 + $0xc2] sm:$0xff]  ;;  %v782_v58 = vld [vmem:[#allocation2 + $0xca] sm:$0xff]  ;;  %v718_v61 = vmul.f32 %v3009_v15, %v681_v55  ;;  %v3074_v2 = vld [vmem:[#allocation2 + $0xd9] sm:$0xff]  ;;  %v919_v5 = vmul.f32 %v3024_v29, %v3070_v0 }
  0x7f   : > { %v818_v62 = vmul.f32 %v3014_v16, %v781_v57  ;;  %v819_v63 = vmul.f32 %v3014_v16, %v782_v58  ;;  %v3072_v1 = vld [vmem:[#allocation2 + $0xe0] sm:$0xff]  ;;  %v1020_v8 = vmul.f32 %v3029_v30, %v3074_v2  ;;  %v3097_v18 = vld [vmem:[#allocation2 + $0xf0] sm:$0xff]  ;;  %v3099_v19 = vld [vmem:[#allocation2 + $0xf8] sm:$0xff] }
  0x80   : > { %v749_v4 = vadd.f32 %v717_v56, %v616_v53  ;;  %v920_v6 = vmul.f32 %v3024_v29, %v3072_v1  ;;  %v3082_v7 = vld [vmem:[#allocation2 + $0xe1] sm:$0xff]  ;;  %v750_v11 = vadd.f32 %v718_v61, %v617_v54  ;;  %v3101_v20 = vld [vmem:[#allocation2 + $0xf1] sm:$0xff]  ;;  %v1223_v22 = vmul.f32 %v3051_v47, %v3097_v18  ;;  %v3107_v24 = vld [vmem:[#allocation2 + $0xf9] sm:$0xff] }
  0x81   : > { %v3086_v9 = vld [vmem:[#allocation2 + $0xda] sm:$0xff]  ;;  %v3088_v10 = vld [vmem:[#allocation2 + $0xe2] sm:$0xff]  ;;  %v1021_v12 = vmul.f32 %v3029_v30, %v3082_v7  ;;  %v1224_v23 = vmul.f32 %v3051_v47, %v3099_v19  ;;  %v1324_v25 = vmul.f32 %v3056_v48, %v3101_v20  ;;  %v3111_v26 = vld [vmem:[#allocation2 + $0xf2] sm:$0xff]  ;;  %v1325_v31 = vmul.f32 %v3056_v48, %v3107_v24 }
  0x82   : > { %v1121_v13 = vmul.f32 %v3039_v37, %v3086_v9  ;;  %v1122_v17 = vmul.f32 %v3039_v37, %v3088_v10  ;;  %v850_v21 = vadd.f32 %v818_v62, %v749_v4  ;;  %v3113_v27 = vld [vmem:[#allocation2 + $0xfa] sm:$0xff]  ;;  %v851_v28 = vadd.f32 %v819_v63, %v750_v11  ;;  %v3139_v39 = vld [vmem:[#allocation2 + $0x22] sm:$0xff]  ;;  %v3145_v55 = vld [vmem:[#allocation2 + $0x30] sm:$0xff] }
  0x83   : > { %v1425_v32 = vmul.f32 %v3064_v59, %v3111_v26  ;;  %v1426_v33 = vmul.f32 %v3064_v59, %v3113_v27  ;;  %v3121_v34 = vld [vmem:[#allocation2 + $0x18] sm:$0xff]  ;;  %v3123_v35 = vld [vmem:[#allocation2 + $0x20] sm:$0xff]  ;;  %v1106_v54 = vmul.f32 %v3039_v37, %v3139_v39  ;;  %v1207_v60 = vmul.f32 %v3051_v47, %v3145_v55 }
  0x84   : > { %v951_v36 = vadd.f32 %v919_v5, %v850_v21  ;;  %v903_v40 = vmul.f32 %v3024_v29, %v3121_v34  ;;  %v904_v41 = vmul.f32 %v3024_v29, %v3123_v35  ;;  %v3129_v42 = vld [vmem:[#allocation2 + $0x19] sm:$0xff]  ;;  %v3131_v43 = vld [vmem:[#allocation2 + $0x21] sm:$0xff]  ;;  %v952_v45 = vadd.f32 %v920_v6, %v851_v28  ;;  %v3149_v57 = vld [vmem:[#allocation2 + $0x31] sm:$0xff] }
  0x85   : > { %v3133_v44 = vld [vmem:[#allocation2 + $0x1a] sm:$0xff]  ;;  %v1004_v46 = vmul.f32 %v3029_v30, %v3129_v42  ;;  %v1005_v49 = vmul.f32 %v3029_v30, %v3131_v43  ;;  %v1308_v63 = vmul.f32 %v3056_v48, %v3149_v57 }
  0x86   : > { %v1105_v50 = vmul.f32 %v3039_v37, %v3133_v44  ;;  %v1052_v51 = vadd.f32 %v1020_v8, %v951_v36  ;;  %v935_v52 = vadd.f32 %v903_v40, %v834_v3  ;;  %v936_v53 = vadd.f32 %v904_v41, %v835_v38  ;;  %v3147_v56 = vld [vmem:[#allocation2 + $0x38] sm:$0xff] }
  0x87   : > { %v1053_v58 = vadd.f32 %v1021_v12, %v952_v45  ;;  %v1208_v61 = vmul.f32 %v3051_v47, %v3147_v56  ;;  %v3155_v62 = vld [vmem:[#allocation2 + $0x39] sm:$0xff]  ;;  %v618_v36 = vmul.f32 %v3004_v14, %v3070_v0  ;;  %v619_v41 = vmul.f32 %v3004_v14, %v3072_v1 }
  0x88   : > { %v1153_v3 = vadd.f32 %v1121_v13, %v1052_v51  ;;  %v1036_v4 = vadd.f32 %v1004_v46, %v935_v52  ;;  %v1037_v5 = vadd.f32 %v1005_v49, %v936_v53  ;;  %v1309_v6 = vmul.f32 %v3056_v48, %v3155_v62  ;;  %v3161_v8 = vld [vmem:[#allocation2 + $0x32] sm:$0xff]  ;;  %v3163_v11 = vld [vmem:[#allocation2 + $0x3a] sm:$0xff] }
  0x89   : > { %v1154_v12 = vadd.f32 %v1122_v17, %v1053_v58  ;;  %v1409_v21 = vmul.f32 %v3064_v59, %v3161_v8  ;;  %v1410_v28 = vmul.f32 %v3064_v59, %v3163_v11  ;;  %v719_v46 = vmul.f32 %v3009_v15, %v3074_v2 }
  0x8a   : > { %v1255_v13 = vadd.f32 %v1223_v22, %v1153_v3  ;;  %v1137_v38 = vadd.f32 %v1105_v50, %v1036_v4  ;;  %v1138_v40 = vadd.f32 %v1106_v54, %v1037_v5  ;;  %v720_v17 = vmul.f32 %v3009_v15, %v3082_v7 }
  0x8b   : > { %v1256_v45 = vadd.f32 %v1224_v23, %v1154_v12  ;;  %v820_v49 = vmul.f32 %v3014_v16, %v3086_v9  ;;  %v821_v0 = vmul.f32 %v3014_v16, %v3088_v10  ;;  %v751_v50 = vadd.f32 %v719_v46, %v618_v36  ;;  %v3195_v12 = vld [vmem:[#allocation2 + $0x110] sm:$0xff] }
  0x8c   : > { %v1356_v51 = vadd.f32 %v1324_v25, %v1255_v13  ;;  %v1239_v52 = vadd.f32 %v1207_v60, %v1137_v38  ;;  %v1240_v53 = vadd.f32 %v1208_v61, %v1138_v40  ;;  %v752_v54 = vadd.f32 %v720_v17, %v619_v41  ;;  %v3197_v36 = vld [vmem:[#allocation2 + $0x109] sm:$0xff]  ;;  %v3203_v38 = vld [vmem:[#allocation2 + $0x111] sm:$0xff] }
  0x8d   : > { %v1357_v22 = vadd.f32 %v1325_v31, %v1256_v45  ;;  %v921_v1 = vmul.f32 %v3024_v29, %v3097_v18  ;;  %v922_v7 = vmul.f32 %v3024_v29, %v3099_v19  ;;  %v852_v9 = vadd.f32 %v820_v49, %v751_v50  ;;  %v3207_v41 = vld [vmem:[#allocation2 + $0x10a] sm:$0xff]  ;;  %v3211_v49 = vld [vmem:[#allocation2 + $0x112] sm:$0xff] }
  0x8e   : > { %v1457_v23 = vadd.f32 %v1425_v32, %v1356_v51  ;;  %v1340_v2 = vadd.f32 %v1308_v63, %v1239_v52  ;;  %v1341_v58 = vadd.f32 %v1309_v6, %v1240_v53  ;;  %v853_v25 = vadd.f32 %v821_v0, %v752_v54 }
  0x8f   : > { %v1458_v3 = vadd.f32 %v1426_v33, %v1357_v22  ;;  %v1022_v60 = vmul.f32 %v3029_v30, %v3101_v20  ;;  %v1023_v31 = vmul.f32 %v3029_v30, %v3107_v24  ;;  %v1123_v4 = vmul.f32 %v3039_v37, %v3111_v26  ;;  %v3193_v33 = vld [vmem:[#allocation2 + $0x108] sm:$0xff] }
  0x90   : > { %v1441_v61 = vadd.f32 %v1409_v21, %v1340_v2  ;;  %v1442_v10 = vadd.f32 %v1410_v28, %v1341_v58  ;;  %v953_v63 = vadd.f32 %v921_v1, %v852_v9  ;;  %v954_v5 = vadd.f32 %v922_v7, %v853_v25  ;;  %v1474_v9 = vld [vmem:[#allocation6 + $0x8] sm:$0xff] }
  0x91   : > { %v2458_v32 = vpack.c.bf16 %v1458_v3, %v1457_v23  ;;  %v1124_v6 = vmul.f32 %v3039_v37, %v3113_v27  ;;  %v1225_v28 = vmul.f32 %v3051_v47, %v3193_v33  ;;  %v1226_v13 = vmul.f32 %v3051_v47, %v3195_v12  ;;  %1553 = vmatprep.mubr.f32.mxu0 %v1474_v9 }
  0x92   : > { %v2460_v21 = vpack.c.bf16 %v1442_v10, %v1441_v61  ;;  %v1326_v40 = vmul.f32 %v3056_v48, %v3197_v36  ;;  %v1054_v45 = vadd.f32 %v1022_v60, %v953_v63  ;;  %v1055_v46 = vadd.f32 %v1023_v31, %v954_v5  ;;  %v3241_v61 = vld [vmem:[#allocation2 + $0x48] sm:$0xff]  ;;  %v3243_v10 = vld [vmem:[#allocation2 + $0x50] sm:$0xff] }
  0x93   : > { %2459 = vmatprep.subr.bf16.mxu0 %v2458_v32  ;;  %v1327_v17 = vmul.f32 %v3056_v48, %v3203_v38  ;;  %v1427_v51 = vmul.f32 %v3064_v59, %v3207_v41  ;;  %v1428_v52 = vmul.f32 %v3064_v59, %v3211_v49  ;;  %v602_v53 = vmul.f32 %v3004_v14, %v3121_v34  ;;  %v3245_v31 = vld [vmem:[#allocation2 + $0x49] sm:$0xff] }
  0x94   : > { %2461 = vmatpush3.bf16.msra.mxu0 %v2460_v21  ;;  %v603_v0 = vmul.f32 %v3004_v14, %v3123_v35  ;;  %v703_v22 = vmul.f32 %v3009_v15, %v3129_v42  ;;  %v1155_v50 = vadd.f32 %v1123_v4, %v1054_v45  ;;  %v1156_v54 = vadd.f32 %v1124_v6, %v1055_v46  ;;  %v3249_v6 = vld [vmem:[#allocation2 + $0x51] sm:$0xff]  ;;  %v488_v21 = vld [vmem:[%s2846_s27 + $0xb0] sm:$0xff] }
  0x95   : > { %v704_v1 = vmul.f32 %v3009_v15, %v3131_v43  ;;  %v804_v23 = vmul.f32 %v3014_v16, %v3133_v44  ;;  %v805_v58 = vmul.f32 %v3014_v16, %v3139_v39  ;;  %v905_v34 = vmul.f32 %v3024_v29, %v3145_v55 }
  0x96   : > { %v735_v2 = vadd.f32 %v703_v22, %v602_v53  ;;  %v906_v35 = vmul.f32 %v3024_v29, %v3147_v56  ;;  %v1257_v7 = vadd.f32 %v1225_v28, %v1155_v50  ;;  %v1258_v42 = vadd.f32 %v1226_v13, %v1156_v54  ;;  %v489_v28 = vld [vmem:[%s2846_s27 + $0xb8] sm:$0xff]  ;;  %v3261_v50 = vld [vmem:[#allocation2 + $0x52] sm:$0xff] }
  0x97   : > { %v736_v3 = vadd.f32 %v704_v1, %v603_v0  ;;  %v1006_v43 = vmul.f32 %v3029_v30, %v3149_v57  ;;  %v1007_v25 = vmul.f32 %v3029_v30, %v3155_v62  ;;  %v1107_v39 = vmul.f32 %v3039_v37, %v3161_v8 }
  0x98   : > { %v836_v44 = vadd.f32 %v804_v23, %v735_v2  ;;  %v1108_v60 = vmul.f32 %v3039_v37, %v3163_v11  ;;  %v1358_v4 = vadd.f32 %v1326_v40, %v1257_v7  ;;  %v1359_v32 = vadd.f32 %v1327_v17, %v1258_v42  ;;  %v3259_v40 = vld [vmem:[#allocation2 + $0x4a] sm:$0xff] }
  0x99   : > { %v837_v63 = vadd.f32 %v805_v58, %v736_v3  ;;  %v1209_v5 = vmul.f32 %v3051_v47, %v3241_v61  ;;  %v1210_v45 = vmul.f32 %v3051_v47, %v3243_v10  ;;  %v1310_v46 = vmul.f32 %v3056_v48, %v3245_v31 }
  0x9a   : > { %v937_v13 = vadd.f32 %v905_v34, %v836_v44  ;;  %v1311_v53 = vmul.f32 %v3056_v48, %v3249_v6  ;;  %v1459_v17 = vadd.f32 %v1427_v51, %v1358_v4  ;;  %v1460_v0 = vadd.f32 %v1428_v52, %v1359_v32  ;;  %v473_v32 = vld [vmem:[%s2846_s27 + $0x38] sm:$0xff] }
  0x9b   : > { %v938_v22 = vadd.f32 %v906_v35, %v837_v63  ;;  %v1411_v54 = vmul.f32 %v3064_v59, %v3259_v40  ;;  %v1412_v23 = vmul.f32 %v3064_v59, %v3261_v50  ;;  %v520_v2 = vmax.f32 %v488_v21, 0.0 }
  0x9c   : > { %v1038_v1 = vadd.f32 %v1006_v43, %v937_v13  ;;  %v521_v58 = vmax.f32 %v489_v28, 0.0  ;;  %v2462_v34 = vpack.c.bf16 %v1460_v0, %v1459_v17  ;;  %v620_v42 = vmul.f32 %v3004_v14, %v3097_v18 }
  0x9d   : > { %v1039_v7 = vadd.f32 %v1007_v25, %v938_v22  ;;  %v621_v51 = vmul.f32 %v3004_v14, %v3099_v19  ;;  %553 = vst.msk [vmem:[#allocation2 + $0x121] sm:$0xff] %vm395_vm0, %v520_v2  ;;  %v721_v35 = vmul.f32 %v3009_v15, %v3101_v20  ;;  %v722_v3 = vmul.f32 %v3009_v15, %v3107_v24  ;;  %v472_v25 = vld [vmem:[%s2846_s27 + $0x30] sm:$0xff] }
  0x9e   : > { %v1139_v52 = vadd.f32 %v1107_v39, %v1038_v1  ;;  %554 = vst.msk [vmem:[#allocation2 + $0x129] sm:$0xff] %vm395_vm0, %v521_v58  ;;  %v822_v43 = vmul.f32 %v3014_v16, %v3111_v26  ;;  %2463 = vmatprep.subr.bf16.mxu0 %v2462_v34  ;;  %v823_v19 = vmul.f32 %v3014_v16, %v3113_v27  ;;  %v505_v0 = vmax.f32 %v473_v32, 0.0 }
  0x9f   : > { %v1140_v18 = vadd.f32 %v1108_v60, %v1039_v7  ;;  %v923_v9 = vmul.f32 %v3024_v29, %v3193_v33  ;;  %v924_v44 = vmul.f32 %v3024_v29, %v3195_v12  ;;  %v753_v20 = vadd.f32 %v721_v35, %v620_v42 }
  0xa0   : > { %v1241_v39 = vadd.f32 %v1209_v5, %v1139_v52  ;;  %v754_v4 = vadd.f32 %v722_v3, %v621_v51  ;;  %v1024_v24 = vmul.f32 %v3029_v30, %v3197_v36  ;;  %v1025_v60 = vmul.f32 %v3029_v30, %v3203_v38  ;;  %538 = vst.msk [vmem:[#allocation2 + $0x69] sm:$0xff] %vm395_vm0, %v505_v0 }
  0xa1   : > { %v1242_v26 = vadd.f32 %v1210_v45, %v1140_v18  ;;  %v1125_v27 = vmul.f32 %v3039_v37, %v3207_v41  ;;  %v1126_v63 = vmul.f32 %v3039_v37, %v3211_v49  ;;  %v854_v28 = vadd.f32 %v822_v43, %v753_v20 }
  0xa2   : > { %v1342_v21 = vadd.f32 %v1310_v46, %v1241_v39  ;;  %v855_v13 = vadd.f32 %v823_v19, %v754_v4  ;;  %v504_v5 = vmax.f32 %v472_v25, 0.0  ;;  %v604_v22 = vmul.f32 %v3004_v14, %v3145_v55  ;;  %v490_v39 = vld [vmem:[%s2846_s27 + $0xc0] sm:$0xff] }
  0xa3   : > { %v1343_v17 = vadd.f32 %v1311_v53, %v1242_v26  ;;  %v605_v45 = vmul.f32 %v3004_v14, %v3147_v56  ;;  %v955_v2 = vadd.f32 %v923_v9, %v854_v28  ;;  %v705_v34 = vmul.f32 %v3009_v15, %v3149_v57 }
  0xa4   : > { %v1443_v1 = vadd.f32 %v1411_v54, %v1342_v21  ;;  %v956_v58 = vadd.f32 %v924_v44, %v855_v13  ;;  %537 = vst.msk [vmem:[#allocation2 + $0x61] sm:$0xff] %vm395_vm0, %v504_v5  ;;  %v3302_v7 = vld [vmem:[#allocation2 + $0x120] sm:$0xff]  ;;  %v706_v55 = vmul.f32 %v3009_v15, %v3155_v62  ;;  %v806_v56 = vmul.f32 %v3014_v16, %v3161_v8 }
  0xa5   : > { %v1444_v46 = vadd.f32 %v1412_v23, %v1343_v17  ;;  %v3304_v42 = vld [vmem:[#allocation2 + $0x128] sm:$0xff]  ;;  %v807_v53 = vmul.f32 %v3014_v16, %v3163_v11  ;;  %v1056_v54 = vadd.f32 %v1024_v24, %v955_v2  ;;  %v1227_v57 = vmul.f32 %v3051_v47, %v3302_v7  ;;  %v491_v17 = vld [vmem:[%s2846_s27 + $0xc8] sm:$0xff] }
  0xa6   : > { %v1057_v51 = vadd.f32 %v1025_v60, %v956_v58  ;;  %v1228_v23 = vmul.f32 %v3051_v47, %v3304_v42  ;;  %v3317_v52 = vld [vmem:[#allocation2 + $0x121] sm:$0xff]  ;;  %v3319_v35 = vld [vmem:[#allocation2 + $0x129] sm:$0xff]  ;;  %v737_v25 = vadd.f32 %v705_v34, %v604_v22  ;;  %v738_v20 = vadd.f32 %v706_v55, %v605_v45 }
  0xa7   : > { %v3321_v62 = vld [vmem:[#allocation2 + $0x122] sm:$0xff]  ;;  %v2464_v3 = vpack.c.bf16 %v1444_v46, %v1443_v1  ;;  %v1328_v8 = vmul.f32 %v3056_v48, %v3317_v52  ;;  %v1329_v11 = vmul.f32 %v3056_v48, %v3319_v35  ;;  %v3327_v43 = vld [vmem:[#allocation2 + $0x12a] sm:$0xff]  ;;  %v1157_v19 = vadd.f32 %v1125_v27, %v1056_v54 }
  0xa8   : > { %v1429_v18 = vmul.f32 %v3064_v59, %v3321_v62  ;;  %v1158_v9 = vadd.f32 %v1126_v63, %v1057_v51  ;;  %v1430_v44 = vmul.f32 %v3064_v59, %v3327_v43  ;;  %v907_v4 = vmul.f32 %v3024_v29, %v3241_v61  ;;  %v3355_v46 = vld [vmem:[#allocation2 + $0x69] sm:$0xff] }
  0xa9   : > { %2465 = vmatpush3.bf16.msra.mxu0 %v2464_v3  ;;  %v908_v24 = vmul.f32 %v3024_v29, %v3243_v10  ;;  %v1008_v32 = vmul.f32 %v3029_v30, %v3245_v31  ;;  %v1259_v26 = vadd.f32 %v1227_v57, %v1157_v19  ;;  %v838_v27 = vadd.f32 %v806_v56, %v737_v25 }
  0xaa   : > { %v1260_v60 = vadd.f32 %v1228_v23, %v1158_v9  ;;  %v1009_v63 = vmul.f32 %v3029_v30, %v3249_v6  ;;  %v839_v21 = vadd.f32 %v807_v53, %v738_v20  ;;  %v1109_v28 = vmul.f32 %v3039_v37, %v3259_v40 }
  0xab   : > { %v1110_v13 = vmul.f32 %v3039_v37, %v3261_v50  ;;  %v3346_v5 = vld [vmem:[#allocation2 + $0x60] sm:$0xff]  ;;  %v522_v0 = vmax.f32 %v490_v39, 0.0  ;;  %v1360_v22 = vadd.f32 %v1328_v8, %v1259_v26  ;;  %v939_v1 = vadd.f32 %v907_v4, %v838_v27  ;;  %v3349_v2 = vld [vmem:[#allocation2 + $0x68] sm:$0xff] }
  0xac   : > { %v1361_v45 = vadd.f32 %v1329_v11, %v1260_v60  ;;  %v1211_v58 = vmul.f32 %v3051_v47, %v3346_v5  ;;  %v3353_v34 = vld [vmem:[#allocation2 + $0x61] sm:$0xff]  ;;  %v940_v55 = vadd.f32 %v908_v24, %v839_v21  ;;  %v1212_v56 = vmul.f32 %v3051_v47, %v3349_v2  ;;  %v3366_v8 = vld [vmem:[#allocation2 + $0x6a] sm:$0xff] }
  0xad   : > { %v1312_v53 = vmul.f32 %v3056_v48, %v3353_v34  ;;  %v1313_v54 = vmul.f32 %v3056_v48, %v3355_v46  ;;  %v3363_v51 = vld [vmem:[#allocation2 + $0x62] sm:$0xff]  ;;  %555 = vst.msk [vmem:[#allocation2 + $0x139] sm:$0xff] %vm395_vm0, %v522_v0  ;;  %v1461_v57 = vadd.f32 %v1429_v18, %v1360_v22  ;;  %v1040_v3 = vadd.f32 %v1008_v32, %v939_v1 }
  0xae   : > { %v1462_v23 = vadd.f32 %v1430_v44, %v1361_v45  ;;  %v1413_v11 = vmul.f32 %v3064_v59, %v3363_v51  ;;  %v1041_v19 = vadd.f32 %v1009_v63, %v940_v55  ;;  %v1414_v9 = vmul.f32 %v3064_v59, %v3366_v8 }
  0xaf   : > { %v523_v25 = vmax.f32 %v491_v17, 0.0  ;;  %v622_v39 = vmul.f32 %v3004_v14, %v3193_v33  ;;  %v1141_v4 = vadd.f32 %v1109_v28, %v1040_v3  ;;  %v623_v18 = vmul.f32 %v3004_v14, %v3195_v12  ;;  %v474_v28 = vld [vmem:[%s2846_s27 + $0x40] sm:$0xff] }
  0xb0   : > { %v2466_v20 = vpack.c.bf16 %v1462_v23, %v1461_v57  ;;  %v723_v44 = vmul.f32 %v3009_v15, %v3197_v36  ;;  %v1142_v24 = vadd.f32 %v1110_v13, %v1041_v19  ;;  %v724_v32 = vmul.f32 %v3009_v15, %v3203_v38  ;;  %v475_v13 = vld [vmem:[%s2846_s27 + $0x48] sm:$0xff] }
  0xb1   : > { %556 = vst.msk [vmem:[#allocation2 + $0x141] sm:$0xff] %vm395_vm0, %v523_v25  ;;  %v824_v26 = vmul.f32 %v3014_v16, %v3207_v41  ;;  %v825_v33 = vmul.f32 %v3014_v16, %v3211_v49  ;;  %v1243_v60 = vadd.f32 %v1211_v58, %v1141_v4  ;;  %v925_v27 = vmul.f32 %v3024_v29, %v3302_v7 }
  0xb2   : > { %2467 = vmatprep.subr.bf16.mxu0 %v2466_v20  ;;  %v755_v12 = vadd.f32 %v723_v44, %v622_v39  ;;  %v926_v36 = vmul.f32 %v3024_v29, %v3304_v42  ;;  %v1244_v63 = vadd.f32 %v1212_v56, %v1142_v24  ;;  %v756_v21 = vadd.f32 %v724_v32, %v623_v18 }
  0xb3   : > { %v1026_v38 = vmul.f32 %v3029_v30, %v3317_v52  ;;  %v1027_v41 = vmul.f32 %v3029_v30, %v3319_v35  ;;  %v1344_v49 = vadd.f32 %v1312_v53, %v1243_v60  ;;  %v1127_v0 = vmul.f32 %v3039_v37, %v3321_v62 }
  0xb4   : > { %v856_v17 = vadd.f32 %v824_v26, %v755_v12  ;;  %v1128_v22 = vmul.f32 %v3039_v37, %v3327_v43  ;;  %v3399_v45 = vld [vmem:[#allocation2 + $0x138] sm:$0xff]  ;;  %v1345_v58 = vadd.f32 %v1313_v54, %v1244_v63  ;;  %v857_v55 = vadd.f32 %v825_v33, %v756_v21 }
  0xb5   : > { %v3401_v1 = vld [vmem:[#allocation2 + $0x139] sm:$0xff]  ;;  %v1229_v56 = vmul.f32 %v3051_v47, %v3399_v45  ;;  %v1445_v53 = vadd.f32 %v1413_v11, %v1344_v49  ;;  %v506_v3 = vmax.f32 %v474_v28, 0.0  ;;  %v507_v19 = vmax.f32 %v475_v13, 0.0 }
  0xb6   : > { %v1330_v57 = vmul.f32 %v3056_v48, %v3401_v1  ;;  %v957_v23 = vadd.f32 %v925_v27, %v856_v17  ;;  %v1446_v25 = vadd.f32 %v1414_v9, %v1345_v58  ;;  %v958_v39 = vadd.f32 %v926_v36, %v857_v55  ;;  %v493_v17 = vld [vmem:[%s2846_s27 + $0xd8] sm:$0xff] }
  0xb7   : > { %v606_v20 = vmul.f32 %v3004_v14, %v3241_v61  ;;  %v607_v4 = vmul.f32 %v3004_v14, %v3243_v10  ;;  %539 = vst.msk [vmem:[#allocation2 + $0x79] sm:$0xff] %vm395_vm0, %v506_v3  ;;  %540 = vst.msk [vmem:[#allocation2 + $0x81] sm:$0xff] %vm395_vm0, %v507_v19  ;;  %v707_v11 = vmul.f32 %v3009_v15, %v3245_v31 }
  0xb8   : > { %v1058_v54 = vadd.f32 %v1026_v38, %v957_v23  ;;  %v3411_v18 = vld [vmem:[#allocation2 + $0x140] sm:$0xff]  ;;  %v708_v9 = vmul.f32 %v3009_v15, %v3249_v6  ;;  %v808_v61 = vmul.f32 %v3014_v16, %v3259_v40  ;;  %v2468_v10 = vpack.c.bf16 %v1446_v25, %v1445_v53 }
  0xb9   : > { %v3413_v44 = vld [vmem:[#allocation2 + $0x141] sm:$0xff]  ;;  %v1059_v24 = vadd.f32 %v1027_v41, %v958_v39  ;;  %v1230_v32 = vmul.f32 %v3051_v47, %v3411_v18  ;;  %v739_v12 = vadd.f32 %v707_v11, %v606_v20  ;;  %v809_v63 = vmul.f32 %v3014_v16, %v3261_v50 }
  0xba   : > { %v1331_v26 = vmul.f32 %v3056_v48, %v3413_v44  ;;  %v3427_v33 = vld [vmem:[#allocation2 + $0x13a] sm:$0xff]  ;;  %v3429_v60 = vld [vmem:[#allocation2 + $0x142] sm:$0xff]  ;;  %v1159_v31 = vadd.f32 %v1127_v0, %v1058_v54  ;;  %2469 = vmatpush3.bf16.msra.mxu0 %v2468_v10  ;;  %v740_v36 = vadd.f32 %v708_v9, %v607_v4  ;;  %v909_v21 = vmul.f32 %v3024_v29, %v3346_v5 }
  0xbb   : > { %v1431_v6 = vmul.f32 %v3064_v59, %v3427_v33  ;;  %v1432_v40 = vmul.f32 %v3064_v59, %v3429_v60  ;;  %v1160_v27 = vadd.f32 %v1128_v22, %v1059_v24  ;;  %v492_v38 = vld [vmem:[%s2846_s27 + $0xd0] sm:$0xff]  ;;  %v840_v28 = vadd.f32 %v808_v61, %v739_v12 }
  0xbc   : > { %v1261_v41 = vadd.f32 %v1229_v56, %v1159_v31  ;;  %v910_v13 = vmul.f32 %v3024_v29, %v3349_v2  ;;  %v1010_v49 = vmul.f32 %v3029_v30, %v3353_v34  ;;  %v841_v58 = vadd.f32 %v809_v63, %v740_v36 }
  0xbd   : > { %v1262_v0 = vadd.f32 %v1230_v32, %v1160_v27  ;;  %v1011_v22 = vmul.f32 %v3029_v30, %v3355_v46  ;;  %v1111_v50 = vmul.f32 %v3039_v37, %v3363_v51  ;;  %v941_v53 = vadd.f32 %v909_v21, %v840_v28 }
  0xbe   : > { %v1362_v55 = vadd.f32 %v1330_v57, %v1261_v41  ;;  %v1112_v56 = vmul.f32 %v3039_v37, %v3366_v8  ;;  %v524_v23 = vmax.f32 %v492_v38, 0.0  ;;  %v942_v19 = vadd.f32 %v910_v13, %v841_v58  ;;  %v3451_v25 = vld [vmem:[#allocation2 + $0x78] sm:$0xff]  ;;  %v3453_v39 = vld [vmem:[#allocation2 + $0x80] sm:$0xff] }
  0xbf   : > { %v1363_v3 = vadd.f32 %v1331_v26, %v1262_v0  ;;  %v525_v20 = vmax.f32 %v493_v17, 0.0  ;;  %v624_v4 = vmul.f32 %v3004_v14, %v3302_v7  ;;  %v1042_v11 = vadd.f32 %v1010_v49, %v941_v53  ;;  %v3461_v61 = vld [vmem:[#allocation2 + $0x79] sm:$0xff]  ;;  %v3463_v10 = vld [vmem:[#allocation2 + $0x81] sm:$0xff] }
  0xc0   : > { %v1463_v54 = vadd.f32 %v1431_v6, %v1362_v55  ;;  %v1213_v57 = vmul.f32 %v3051_v47, %v3451_v25  ;;  %v1214_v9 = vmul.f32 %v3051_v47, %v3453_v39  ;;  %557 = vst.msk [vmem:[#allocation2 + $0x151] sm:$0xff] %vm395_vm0, %v524_v23  ;;  %v1043_v32 = vadd.f32 %v1011_v22, %v942_v19  ;;  %v3470_v31 = vld [vmem:[#allocation2 + $0x7a] sm:$0xff]  ;;  %v3472_v6 = vld [vmem:[#allocation2 + $0x82] sm:$0xff] }
  0xc1   : > { %v1464_v24 = vadd.f32 %v1432_v40, %v1363_v3  ;;  %v1314_v26 = vmul.f32 %v3056_v48, %v3461_v61  ;;  %v1315_v7 = vmul.f32 %v3056_v48, %v3463_v10  ;;  %558 = vst.msk [vmem:[#allocation2 + $0x159] sm:$0xff] %vm395_vm0, %v525_v20  ;;  %v1143_v12 = vadd.f32 %v1111_v50, %v1042_v11  ;;  %v476_v22 = vld [vmem:[%s2846_s27 + $0x50] sm:$0xff]  ;;  %v477_v20 = vld [vmem:[%s2846_s27 + $0x58] sm:$0xff] }
  0xc2   : > { %v1415_v27 = vmul.f32 %v3064_v59, %v3470_v31  ;;  %v1416_v40 = vmul.f32 %v3064_v59, %v3472_v6  ;;  %v625_v36 = vmul.f32 %v3004_v14, %v3304_v42  ;;  %v1144_v21 = vadd.f32 %v1112_v56, %v1043_v32 }
  0xc3   : > { %v2470_v63 = vpack.c.bf16 %v1464_v24, %v1463_v54  ;;  %v725_v38 = vmul.f32 %v3009_v15, %v3317_v52  ;;  %v726_v41 = vmul.f32 %v3009_v15, %v3319_v35  ;;  %v1245_v28 = vadd.f32 %v1213_v57, %v1143_v12 }
  0xc4   : > { %v826_v13 = vmul.f32 %v3014_v16, %v3321_v62  ;;  %v827_v49 = vmul.f32 %v3014_v16, %v3327_v43  ;;  %v927_v17 = vmul.f32 %v3024_v29, %v3399_v45  ;;  %v1246_v42 = vadd.f32 %v1214_v9, %v1144_v21 }
  0xc5   : > { %2471 = vmatprep.subr.bf16.mxu0 %v2470_v63  ;;  %v757_v0 = vadd.f32 %v725_v38, %v624_v4  ;;  %v758_v58 = vadd.f32 %v726_v41, %v625_v36  ;;  %v928_v52 = vmul.f32 %v3024_v29, %v3411_v18  ;;  %v1346_v35 = vadd.f32 %v1314_v26, %v1245_v28 }
  0xc6   : > { %v1028_v50 = vmul.f32 %v3029_v30, %v3401_v1  ;;  %v1029_v62 = vmul.f32 %v3029_v30, %v3413_v44  ;;  %v1129_v43 = vmul.f32 %v3039_v37, %v3427_v33  ;;  %v1347_v55 = vadd.f32 %v1315_v7, %v1246_v42 }
  0xc7   : > { %v858_v53 = vadd.f32 %v826_v13, %v757_v0  ;;  %v859_v56 = vadd.f32 %v827_v49, %v758_v58  ;;  %v1130_v23 = vmul.f32 %v3039_v37, %v3429_v60  ;;  %v3502_v3 = vld [vmem:[#allocation2 + $0x150] sm:$0xff]  ;;  %v1447_v4 = vadd.f32 %v1415_v27, %v1346_v35 }
  0xc8   : > { %v3504_v19 = vld [vmem:[#allocation2 + $0x151] sm:$0xff]  ;;  %v1231_v11 = vmul.f32 %v3051_v47, %v3502_v3  ;;  %v508_v9 = vmax.f32 %v476_v22, 0.0  ;;  %v1448_v24 = vadd.f32 %v1416_v40, %v1347_v55  ;;  %v3515_v12 = vld [vmem:[#allocation2 + $0x159] sm:$0xff]  ;;  %v509_v38 = vmax.f32 %v477_v20, 0.0 }
  0xc9   : > { %v3507_v54 = vld [vmem:[#allocation2 + $0x158] sm:$0xff]  ;;  %v1332_v57 = vmul.f32 %v3056_v48, %v3504_v19  ;;  %v959_v32 = vadd.f32 %v927_v17, %v858_v53  ;;  %v960_v26 = vadd.f32 %v928_v52, %v859_v56  ;;  %v1333_v63 = vmul.f32 %v3056_v48, %v3515_v12 }
  0xca   : > { %v1232_v7 = vmul.f32 %v3051_v47, %v3507_v54  ;;  %v3517_v36 = vld [vmem:[#allocation2 + $0x152] sm:$0xff]  ;;  %v3519_v27 = vld [vmem:[#allocation2 + $0x15a] sm:$0xff]  ;;  %541 = vst.msk [vmem:[#allocation2 + $0x91] sm:$0xff] %vm395_vm0, %v508_v9  ;;  %v2472_v41 = vpack.c.bf16 %v1448_v24, %v1447_v4  ;;  %v608_v49 = vmul.f32 %v3004_v14, %v3346_v5  ;;  %542 = vst.msk [vmem:[#allocation2 + $0x99] sm:$0xff] %vm395_vm0, %v509_v38 }
  0xcb   : > { %v1433_v21 = vmul.f32 %v3064_v59, %v3517_v36  ;;  %v1434_v40 = vmul.f32 %v3064_v59, %v3519_v27  ;;  %v1060_v28 = vadd.f32 %v1028_v50, %v959_v32  ;;  %v1061_v13 = vadd.f32 %v1029_v62, %v960_v26  ;;  %v494_v50 = vld [vmem:[%s2846_s27 + $0xe0] sm:$0xff]  ;;  %v495_v55 = vld [vmem:[%s2846_s27 + $0xe8] sm:$0xff] }
  0xcc   : > { %v609_v17 = vmul.f32 %v3004_v14, %v3349_v2  ;;  %v709_v42 = vmul.f32 %v3009_v15, %v3353_v34  ;;  %v710_v0 = vmul.f32 %v3009_v15, %v3355_v46  ;;  %v810_v58 = vmul.f32 %v3014_v16, %v3363_v51  ;;  %2473 = vmatpush3.bf16.msra.mxu0 %v2472_v41 }
  0xcd   : > { %v1161_v52 = vadd.f32 %v1129_v43, %v1060_v28  ;;  %v1162_v22 = vadd.f32 %v1130_v23, %v1061_v13  ;;  %v811_v5 = vmul.f32 %v3014_v16, %v3366_v8  ;;  %v911_v35 = vmul.f32 %v3024_v29, %v3451_v25 }
  0xce   : > { %v741_v2 = vadd.f32 %v709_v42, %v608_v49  ;;  %v742_v62 = vadd.f32 %v710_v0, %v609_v17  ;;  %v912_v34 = vmul.f32 %v3024_v29, %v3453_v39  ;;  %v1012_v46 = vmul.f32 %v3029_v30, %v3461_v61 }
  0xcf   : > { %v1263_v51 = vadd.f32 %v1231_v11, %v1161_v52  ;;  %v1264_v53 = vadd.f32 %v1232_v7, %v1162_v22  ;;  %v1013_v43 = vmul.f32 %v3029_v30, %v3463_v10  ;;  %v1113_v16 = vmul.f32 %v3039_v37, %v3470_v31 }
  0xd0   : > { %v842_v8 = vadd.f32 %v810_v58, %v741_v2  ;;  %v843_v56 = vadd.f32 %v811_v5, %v742_v62  ;;  %v1114_v23 = vmul.f32 %v3039_v37, %v3472_v6  ;;  %v526_v20 = vmax.f32 %v494_v50, 0.0  ;;  %v3592_v2 = vld [vmem:[%s4103_s2 + $0x2] ss:$0 sm:$0xff] }
  0xd1   : > { %v1364_v4 = vadd.f32 %v1332_v57, %v1263_v51  ;;  %v1365_v9 = vadd.f32 %v1333_v63, %v1264_v53  ;;  %v3555_v24 = vld [vmem:[#allocation2 + $0x90] sm:$0xff]  ;;  %v527_v11 = vmax.f32 %v495_v55, 0.0  ;;  %v626_v26 = vmul.f32 %v3004_v14, %v3399_v45  ;;  %v3566_v13 = vld [vmem:[#allocation2 + $0x98] sm:$0xff] }
  0xd2   : > { %v3557_v32 = vld [vmem:[#allocation2 + $0x91] sm:$0xff]  ;;  %v943_v7 = vadd.f32 %v911_v35, %v842_v8  ;;  %v944_v38 = vadd.f32 %v912_v34, %v843_v56  ;;  %v1215_v41 = vmul.f32 %v3051_v47, %v3555_v24  ;;  %559 = vst.msk [vmem:[#allocation2 + $0x169] sm:$0xff] %vm395_vm0, %v526_v20  ;;  %v3568_v49 = vld [vmem:[#allocation2 + $0x99] sm:$0xff]  ;;  %v627_v45 = vmul.f32 %v3004_v14, %v3411_v18 }
  0xd3   : > { %v1316_v28 = vmul.f32 %v3056_v48, %v3557_v32  ;;  %v1465_v57 = vadd.f32 %v1433_v21, %v1364_v4  ;;  %v1466_v63 = vadd.f32 %v1434_v40, %v1365_v9  ;;  %560 = vst.msk [vmem:[#allocation2 + $0x171] sm:$0xff] %vm395_vm0, %v527_v11  ;;  %v727_v17 = vmul.f32 %v3009_v15, %v3401_v1  ;;  %v3579_v40 = vld [vmem:[#allocation2 + $0x92] sm:$0xff]  ;;  %v3581_v52 = vld [vmem:[#allocation2 + $0x9a] sm:$0xff] }
  0xd4   : > { %v1044_v42 = vadd.f32 %v1012_v46, %v943_v7  ;;  %v1045_v0 = vadd.f32 %v1013_v43, %v944_v38  ;;  %v1216_v58 = vmul.f32 %v3051_v47, %v3566_v13  ;;  %v1317_v21 = vmul.f32 %v3056_v48, %v3568_v49  ;;  %v479_v56 = vld [vmem:[%s2846_s27 + $0x68] sm:$0xff] }
  0xd5   : > { %v2474_v22 = vpack.c.bf16 %v1466_v63, %v1465_v57  ;;  %v1417_v5 = vmul.f32 %v3064_v59, %v3579_v40  ;;  %v1418_v14 = vmul.f32 %v3064_v59, %v3581_v52  ;;  %v728_v1 = vmul.f32 %v3009_v15, %v3413_v44 }
  0xd6   : > { %v1145_v18 = vadd.f32 %v1113_v16, %v1044_v42  ;;  %v1146_v35 = vadd.f32 %v1114_v23, %v1045_v0  ;;  %v759_v50 = vadd.f32 %v727_v17, %v626_v26  ;;  %v828_v62 = vmul.f32 %v3592_v2, %v3427_v33 }
  0xd7   : > { %2475 = vmatprep.subr.bf16.mxu0 %v2474_v22  ;;  %v760_v34 = vadd.f32 %v728_v1, %v627_v45  ;;  %v829_v46 = vmul.f32 %v3592_v2, %v3429_v60  ;;  %v929_v15 = vmul.f32 %v3024_v29, %v3502_v3  ;;  %v930_v44 = vmul.f32 %v3024_v29, %v3507_v54  ;;  %v478_v60 = vld [vmem:[%s2846_s27 + $0x60] sm:$0xff]  ;;  %v3635_v1 = vld [vmem:[%s4103_s2] ss:$0 sm:$0xff] }
  0xd8   : > { %v1247_v55 = vadd.f32 %v1215_v41, %v1145_v18  ;;  %v1248_v51 = vadd.f32 %v1216_v58, %v1146_v35  ;;  %v860_v53 = vadd.f32 %v828_v62, %v759_v50  ;;  %v1030_v43 = vmul.f32 %v3029_v30, %v3504_v19  ;;  %v3659_v62 = vld [vmem:[%s4103_s2 + $0x8] ss:$0 sm:$0xff] }
  0xd9   : > { %v861_v16 = vadd.f32 %v829_v46, %v760_v34  ;;  %v1031_v33 = vmul.f32 %v3029_v30, %v3515_v12  ;;  %v1131_v8 = vmul.f32 %v3039_v37, %v3517_v36  ;;  %v1132_v29 = vmul.f32 %v3039_v37, %v3519_v27  ;;  %v3612_v9 = vld [vmem:[#allocation2 + $0x168] sm:$0xff] }
  0xda   : > { %v1348_v23 = vadd.f32 %v1316_v28, %v1247_v55  ;;  %v1349_v20 = vadd.f32 %v1317_v21, %v1248_v51  ;;  %v961_v4 = vadd.f32 %v929_v15, %v860_v53  ;;  %v3614_v11 = vld [vmem:[#allocation2 + $0x170] sm:$0xff]  ;;  %v1233_v30 = vmul.f32 %v3051_v47, %v3612_v9  ;;  %v497_v53 = vld [vmem:[%s2846_s27 + $0xf8] sm:$0xff] }
  0xdb   : > { %v3616_v26 = vld [vmem:[#allocation2 + $0x169] sm:$0xff]  ;;  %v962_v7 = vadd.f32 %v930_v44, %v861_v16  ;;  %v1234_v38 = vmul.f32 %v3051_v47, %v3614_v11  ;;  %v3622_v41 = vld [vmem:[#allocation2 + $0x171] sm:$0xff]  ;;  %v510_v58 = vmax.f32 %v478_v60, 0.0  ;;  %v511_v21 = vmax.f32 %v479_v56, 0.0 }
  0xdc   : > { %v1334_v28 = vmul.f32 %v3056_v48, %v3616_v26  ;;  %v1449_v57 = vadd.f32 %v1417_v5, %v1348_v23  ;;  %v1450_v37 = vadd.f32 %v1418_v14, %v1349_v20  ;;  %v1062_v63 = vadd.f32 %v1030_v43, %v961_v4  ;;  %v3628_v17 = vld [vmem:[#allocation2 + $0x16a] sm:$0xff]  ;;  %v3641_v18 = vld [vmem:[#allocation2 + $0x172] sm:$0xff] }
  0xdd   : > { %v1335_v45 = vmul.f32 %v3056_v48, %v3622_v41  ;;  %v1063_v42 = vadd.f32 %v1031_v33, %v962_v7  ;;  %v1435_v0 = vmul.f32 %v3064_v59, %v3628_v17  ;;  %v610_v5 = vmul.f32 %v3635_v1, %v3451_v25  ;;  %543 = vst.msk [vmem:[#allocation2 + $0xa9] sm:$0xff] %vm395_vm0, %v510_v58  ;;  %v3648_v59 = vld [vmem:[%s4103_s2 + $0x1] ss:$0 sm:$0xff] }
  0xde   : > { %v2476_v47 = vpack.c.bf16 %v1450_v37, %v1449_v57  ;;  %v1163_v22 = vadd.f32 %v1131_v8, %v1062_v63  ;;  %v611_v48 = vmul.f32 %v3635_v1, %v3453_v39  ;;  %544 = vst.msk [vmem:[#allocation2 + $0xb1] sm:$0xff] %vm395_vm0, %v511_v21  ;;  %v711_v25 = vmul.f32 %v3648_v59, %v3461_v61  ;;  %v3668_v61 = vld [vmem:[%s4103_s2 + $0x3] ss:$0 sm:$0xff]  ;;  %v3688_v8 = vld [vmem:[%s4103_s2 + $0x5] ss:$0 sm:$0xff] }
  0xdf   : > { %v1164_v14 = vadd.f32 %v1132_v29, %v1063_v42  ;;  %v712_v39 = vmul.f32 %v3648_v59, %v3463_v10  ;;  %v812_v35 = vmul.f32 %v3592_v2, %v3470_v31  ;;  %v1436_v34 = vmul.f32 %v3659_v62, %v3641_v18  ;;  %v496_v31 = vld [vmem:[%s2846_s27 + $0xf0] sm:$0xff] }
  0xe0   : > { %2477 = vmatpush3.bf16.msra.mxu0 %v2476_v47  ;;  %v1265_v50 = vadd.f32 %v1233_v30, %v1163_v22  ;;  %v813_v46 = vmul.f32 %v3592_v2, %v3472_v6  ;;  %v913_v10 = vmul.f32 %v3668_v61, %v3555_v24  ;;  %v743_v44 = vadd.f32 %v711_v25, %v610_v5  ;;  %v3679_v6 = vld [vmem:[%s4103_s2 + $0x4] ss:$0 sm:$0xff]  ;;  %v3715_v5 = vld [vmem:[%s4103_s2 + $0x6] ss:$0 sm:$0xff] }
  0xe1   : > { %v1266_v15 = vadd.f32 %v1234_v38, %v1164_v14  ;;  %v744_v55 = vadd.f32 %v712_v39, %v611_v48  ;;  %v914_v51 = vmul.f32 %v3668_v61, %v3566_v13  ;;  %v1014_v16 = vmul.f32 %v3679_v6, %v3557_v32 }
  0xe2   : > { %v1366_v43 = vadd.f32 %v1334_v28, %v1265_v50  ;;  %v1015_v33 = vmul.f32 %v3679_v6, %v3568_v49  ;;  %v1115_v60 = vmul.f32 %v3688_v8, %v3579_v40  ;;  %v844_v23 = vadd.f32 %v812_v35, %v743_v44 }
  0xe3   : > { %v1367_v56 = vadd.f32 %v1335_v45, %v1266_v15  ;;  %v845_v20 = vadd.f32 %v813_v46, %v744_v55  ;;  %v528_v4 = vmax.f32 %v496_v31, 0.0  ;;  %v1116_v7 = vmul.f32 %v3688_v8, %v3581_v52 }
  0xe4   : > { %v1467_v29 = vadd.f32 %v1435_v0, %v1366_v43  ;;  %v529_v30 = vmax.f32 %v497_v53, 0.0  ;;  %v628_v38 = vmul.f32 %v3635_v1, %v3502_v3  ;;  %v945_v57 = vadd.f32 %v913_v10, %v844_v23  ;;  %v3699_v45 = vld [vmem:[#allocation2 + $0xa8] sm:$0xff] }
  0xe5   : > { %v1468_v28 = vadd.f32 %v1436_v34, %v1367_v56  ;;  %v946_v37 = vadd.f32 %v914_v51, %v845_v20  ;;  %561 = vst.msk [vmem:[#allocation2 + $0x181] sm:$0xff] %vm395_vm0, %v528_v4  ;;  %v729_v63 = vmul.f32 %v3648_v59, %v3504_v19  ;;  %v629_v42 = vmul.f32 %v3635_v1, %v3507_v54  ;;  %v3710_v19 = vld [vmem:[#allocation2 + $0xb0] sm:$0xff] }
  0xe6   : > { %562 = vst.msk [vmem:[#allocation2 + $0x189] sm:$0xff] %vm395_vm0, %v529_v30  ;;  %v730_v0 = vmul.f32 %v3648_v59, %v3515_v12  ;;  %v830_v3 = vmul.f32 %v3592_v2, %v3517_v36  ;;  %v831_v58 = vmul.f32 %v3592_v2, %v3519_v27  ;;  %v1046_v47 = vadd.f32 %v1014_v16, %v945_v57  ;;  %v3719_v12 = vld [vmem:[#allocation2 + $0xa9] sm:$0xff]  ;;  %v3721_v48 = vld [vmem:[#allocation2 + $0xb1] sm:$0xff]  ;;  %v3728_v27 = vld [vmem:[%s4103_s2 + $0x7] ss:$0 sm:$0xff] }
  0xe7   : > { %v2478_v21 = vpack.c.bf16 %v1468_v28, %v1467_v29  ;;  %v1047_v22 = vadd.f32 %v1015_v33, %v946_v37  ;;  %v1217_v54 = vmul.f32 %v3715_v5, %v3699_v45  ;;  %v1218_v36 = vmul.f32 %v3715_v5, %v3710_v19  ;;  %v3734_v39 = vld [vmem:[#allocation2 + $0xaa] sm:$0xff]  ;;  %v3738_v46 = vld [vmem:[#allocation2 + $0xb2] sm:$0xff] }
  0xe8   : > { %v1318_v14 = vmul.f32 %v3728_v27, %v3719_v12  ;;  %v1319_v25 = vmul.f32 %v3728_v27, %v3721_v48  ;;  %v931_v35 = vmul.f32 %v3668_v61, %v3612_v9  ;;  %v1147_v50 = vadd.f32 %v1115_v60, %v1046_v47 }
  0xe9   : > { %2479 = vmatprep.subr.bf16.mxu0 %v2478_v21  ;;  %v1148_v34 = vadd.f32 %v1116_v7, %v1047_v22  ;;  %v1419_v10 = vmul.f32 %v3659_v62, %v3734_v39  ;;  %v761_v31 = vadd.f32 %v729_v63, %v628_v38  ;;  %v1420_v15 = vmul.f32 %v3659_v62, %v3738_v46 }
  0xea   : > { %v762_v44 = vadd.f32 %v730_v0, %v629_v42  ;;  %v932_v55 = vmul.f32 %v3668_v61, %v3614_v11  ;;  %v1032_v51 = vmul.f32 %v3679_v6, %v3616_v26  ;;  %v1249_v53 = vadd.f32 %v1217_v54, %v1147_v50 }
  0xeb   : > { %v1250_v43 = vadd.f32 %v1218_v36, %v1148_v34  ;;  %v862_v16 = vadd.f32 %v830_v3, %v761_v31  ;;  %v1033_v33 = vmul.f32 %v3679_v6, %v3622_v41  ;;  %v1133_v56 = vmul.f32 %v3688_v8, %v3628_v17 }
  0xec   : > { %v863_v60 = vadd.f32 %v831_v58, %v762_v44  ;;  %v1134_v23 = vmul.f32 %v3688_v8, %v3641_v18  ;;  %v612_v20 = vmul.f32 %v3635_v1, %v3555_v24  ;;  %v1350_v4 = vadd.f32 %v1318_v14, %v1249_v53  ;;  %v3756_v30 = vld [vmem:[#allocation2 + $0x180] sm:$0xff] }
  0xed   : > { %v1351_v29 = vadd.f32 %v1319_v25, %v1250_v43  ;;  %v963_v7 = vadd.f32 %v931_v35, %v862_v16  ;;  %v3758_v38 = vld [vmem:[#allocation2 + $0x188] sm:$0xff]  ;;  %v613_v57 = vmul.f32 %v3635_v1, %v3566_v13  ;;  %v1235_v63 = vmul.f32 %v3715_v5, %v3756_v30 }
  0xee   : > { %v3760_v28 = vld [vmem:[#allocation2 + $0x181] sm:$0xff]  ;;  %v964_v37 = vadd.f32 %v932_v55, %v863_v60  ;;  %v1236_v42 = vmul.f32 %v3715_v5, %v3758_v38  ;;  %v3768_v24 = vld [vmem:[#allocation2 + $0x189] sm:$0xff]  ;;  %v1451_v3 = vadd.f32 %v1419_v10, %v1350_v4  ;;  %v713_v36 = vmul.f32 %v3648_v59, %v3557_v32 }
  0xef   : > { %v1336_v0 = vmul.f32 %v3728_v27, %v3760_v28  ;;  %v1452_v58 = vadd.f32 %v1420_v15, %v1351_v29  ;;  %v1064_v21 = vadd.f32 %v1032_v51, %v963_v7  ;;  %v1337_v47 = vmul.f32 %v3728_v27, %v3768_v24  ;;  %v3774_v22 = vld [vmem:[#allocation2 + $0x182] sm:$0xff]  ;;  %v3786_v31 = vld [vmem:[#allocation2 + $0x18a] sm:$0xff] }
  0xf0   : > { %v1065_v13 = vadd.f32 %v1033_v33, %v964_v37  ;;  %v1437_v54 = vmul.f32 %v3659_v62, %v3774_v22  ;;  %v714_v14 = vmul.f32 %v3648_v59, %v3568_v49  ;;  %v814_v50 = vmul.f32 %v3592_v2, %v3579_v40  ;;  %v3804_v7 = vld [vmem:[#allocation2 + $0xc8] sm:$0xff] }
  0xf1   : > { %v2480_v25 = vpack.c.bf16 %v1452_v58, %v1451_v3  ;;  %v1165_v35 = vadd.f32 %v1133_v56, %v1064_v21  ;;  %v815_v34 = vmul.f32 %v3592_v2, %v3581_v52  ;;  %v745_v15 = vadd.f32 %v713_v36, %v612_v20  ;;  %v3808_v37 = vld [vmem:[#allocation2 + $0xc1] sm:$0xff] }
  0xf2   : > { %v1166_v10 = vadd.f32 %v1134_v23, %v1065_v13  ;;  %v746_v44 = vadd.f32 %v714_v14, %v613_v57  ;;  %v915_v55 = vmul.f32 %v3668_v61, %v3699_v45  ;;  %v1438_v49 = vmul.f32 %v3659_v62, %v3786_v31  ;;  %v3802_v23 = vld [vmem:[#allocation2 + $0xc0] sm:$0xff] }
  0xf3   : > { %2481 = vmatpush3.bf16.msra.mxu0 %v2480_v25  ;;  %v1267_v32 = vadd.f32 %v1235_v63, %v1165_v35  ;;  %v916_v51 = vmul.f32 %v3668_v61, %v3710_v19  ;;  %v1016_v40 = vmul.f32 %v3679_v6, %v3719_v12  ;;  %v846_v53 = vadd.f32 %v814_v50, %v745_v15  ;;  %v3810_v63 = vld [vmem:[#allocation2 + $0xc9] sm:$0xff] }
  0xf4   : > { %v1268_v52 = vadd.f32 %v1236_v42, %v1166_v10  ;;  %v847_v43 = vadd.f32 %v815_v34, %v746_v44  ;;  %v1017_v16 = vmul.f32 %v3679_v6, %v3721_v48  ;;  %v1117_v60 = vmul.f32 %v3688_v8, %v3734_v39  ;;  %v3830_v44 = vld [vmem:[#allocation2 + $0xc2] sm:$0xff] }
  0xf5   : > { %v1368_v33 = vadd.f32 %v1336_v0, %v1267_v32  ;;  %v1118_v56 = vmul.f32 %v3688_v8, %v3738_v46  ;;  %v947_v4 = vadd.f32 %v915_v55, %v846_v53  ;;  %v1219_v57 = vmul.f32 %v3715_v5, %v3802_v23 }
  0xf6   : > { %v1369_v20 = vadd.f32 %v1337_v47, %v1268_v52  ;;  %v948_v29 = vadd.f32 %v916_v51, %v847_v43  ;;  %v1220_v0 = vmul.f32 %v3715_v5, %v3804_v7  ;;  %v1320_v3 = vmul.f32 %v3728_v27, %v3808_v37  ;;  %v1200_v51 = vld [vmem:[#allocation2 + $0x198] sm:$0xff]  ;;  %v1201_v43 = vld [vmem:[#allocation2 + $0x1a0] sm:$0xff] }
  0xf7   : > { %v1469_v42 = vadd.f32 %v1437_v54, %v1368_v33  ;;  %v1321_v58 = vmul.f32 %v3728_v27, %v3810_v63  ;;  %v1048_v47 = vadd.f32 %v1016_v40, %v947_v4  ;;  %v630_v36 = vmul.f32 %v3635_v1, %v3612_v9  ;;  %v3832_v9 = vld [vmem:[#allocation2 + $0xca] sm:$0xff] }
  0xf8   : > { %v1470_v21 = vadd.f32 %v1438_v49, %v1369_v20  ;;  %v1049_v13 = vadd.f32 %v1017_v16, %v948_v29  ;;  %v631_v14 = vmul.f32 %v3635_v1, %v3614_v11  ;;  %v731_v54 = vmul.f32 %v3648_v59, %v3616_v26 }
  0xf9   : > { %v732_v25 = vmul.f32 %v3648_v59, %v3622_v41  ;;  %v832_v35 = vmul.f32 %v3592_v2, %v3628_v17  ;;  %v1149_v34 = vadd.f32 %v1117_v60, %v1048_v47  ;;  %v833_v15 = vmul.f32 %v3592_v2, %v3641_v18 }
  0xfa   : > { %v2482_v50 = vpack.c.bf16 %v1470_v21, %v1469_v42  ;;  %v1150_v10 = vadd.f32 %v1118_v56, %v1049_v13  ;;  %v763_v11 = vadd.f32 %v731_v54, %v630_v36  ;;  %v933_v26 = vmul.f32 %v3668_v61, %v3756_v30  ;;  %v1402_v13 = vld [vmem:[#allocation2 + $0x19a] sm:$0xff] }
  0xfb   : > { %v764_v55 = vadd.f32 %v732_v25, %v631_v14  ;;  %v934_v41 = vmul.f32 %v3668_v61, %v3758_v38  ;;  %v1251_v17 = vadd.f32 %v1219_v57, %v1149_v34  ;;  %v1421_v49 = vmul.f32 %v3659_v62, %v3830_v44  ;;  %v1301_v38 = vld [vmem:[#allocation2 + $0x199] sm:$0xff] }
  0xfc   : > { %2483 = vmatprep.subr.bf16.mxu0 %v2482_v50  ;;  %v1252_v32 = vadd.f32 %v1220_v0, %v1150_v10  ;;  %v1422_v18 = vmul.f32 %v3659_v62, %v3832_v9  ;;  %v864_v40 = vadd.f32 %v832_v35, %v763_v11  ;;  %v1034_v53 = vmul.f32 %v3679_v6, %v3760_v28  ;;  %v1302_v0 = vld [vmem:[#allocation2 + $0x1a1] sm:$0xff] }
  0xfd   : > { %v865_v52 = vadd.f32 %v833_v15, %v764_v55  ;;  %v1035_v30 = vmul.f32 %v3679_v6, %v3768_v24  ;;  %v1352_v16 = vadd.f32 %v1320_v3, %v1251_v17  ;;  %v1135_v60 = vmul.f32 %v3688_v8, %v3774_v22 }
  0xfe   : > { %v1353_v33 = vadd.f32 %v1321_v58, %v1252_v32  ;;  %v965_v56 = vadd.f32 %v933_v26, %v864_v40  ;;  %v1136_v4 = vmul.f32 %v3688_v8, %v3786_v31  ;;  %v1237_v29 = vmul.f32 %v3715_v5, %v1200_v51  ;;  %v1403_v31 = vld [vmem:[#allocation2 + $0x1a2] sm:$0xff]  ;;  %v1285_v51 = vld [vmem:[#allocation2 + $0xd9] sm:$0xff] }
  0xff   : > { %v966_v20 = vadd.f32 %v934_v41, %v865_v52  ;;  %v1453_v57 = vadd.f32 %v1421_v49, %v1352_v16  ;;  %v1238_v28 = vmul.f32 %v3715_v5, %v1201_v43  ;;  %v1338_v24 = vmul.f32 %v3728_v27, %v1301_v38  ;;  %v1185_v41 = vld [vmem:[#allocation2 + $0xe0] sm:$0xff] }
 0x100   : > { %v1454_v42 = vadd.f32 %v1422_v18, %v1353_v33  ;;  %v1066_v21 = vadd.f32 %v1034_v53, %v965_v56  ;;  %v614_v58 = vmul.f32 %v3635_v1, %v3699_v45  ;;  %v615_v22 = vmul.f32 %v3635_v1, %v3710_v19  ;;  %v1286_v40 = vld [vmem:[#allocation2 + $0xe1] sm:$0xff] }
 0x101   : > { %v1067_v3 = vadd.f32 %v1035_v30, %v966_v20  ;;  %v715_v36 = vmul.f32 %v3648_v59, %v3719_v12  ;;  %v716_v14 = vmul.f32 %v3648_v59, %v3721_v48  ;;  %v816_v54 = vmul.f32 %v3592_v2, %v3734_v39  ;;  %v1386_v30 = vld [vmem:[#allocation2 + $0xda] sm:$0xff]  ;;  %v1387_v43 = vld [vmem:[#allocation2 + $0xe2] sm:$0xff] }
 0x102   : > { %v2484_v47 = vpack.c.bf16 %v1454_v42, %v1453_v57  ;;  %v1167_v25 = vadd.f32 %v1135_v60, %v1066_v21  ;;  %v1339_v50 = vmul.f32 %v3728_v27, %v1302_v0  ;;  %v817_v45 = vmul.f32 %v3592_v2, %v3738_v46  ;;  %v1473_v42 = vld [vmem:[#allocation6] sm:$0xff]  ;;  %v1475_v0 = vld [vmem:[#allocation6 + $0x10] sm:$0xff]  ;;  %v1480_v21 = vld [vmem:[#allocation6 + $0x38] sm:$0xff] }
 0x103   : > { %v1168_v35 = vadd.f32 %v1136_v4, %v1067_v3  ;;  %v747_v1 = vadd.f32 %v715_v36, %v614_v58  ;;  %v748_v19 = vadd.f32 %v716_v14, %v615_v22  ;;  %v917_v34 = vmul.f32 %v3668_v61, %v3802_v23  ;;  %v1184_v23 = vld [vmem:[#allocation2 + $0xd8] sm:$0xff]  ;;  %v1479_v3 = vld [vmem:[#allocation6 + $0x30] sm:$0xff]  ;;  %v1481_v58 = vld [vmem:[#allocation6 + $0x40] sm:$0xff] }
 0x104   : > { %2485 = vmatpush3.bf16.msra.mxu0 %v2484_v47  ;;  %v918_v12 = vmul.f32 %v3668_v61, %v3804_v7  ;;  %v1269_v59 = vadd.f32 %v1237_v29, %v1167_v25  ;;  %v1439_v39 = vmul.f32 %v3659_v62, %v1402_v13  ;;  %v1440_v10 = vmul.f32 %v3659_v62, %v1403_v31  ;;  %v1484_v22 = vld [vmem:[#allocation6 + $0x58] sm:$0xff]  ;;  %v1483_v47 = vld [vmem:[#allocation6 + $0x50] sm:$0xff]  ;;  %v1486_v13 = vld [vmem:[#allocation6 + $0x68] sm:$0xff] }
 0x105   : > { %v1270_v48 = vadd.f32 %v1238_v28, %v1168_v35  ;;  %v848_v15 = vadd.f32 %v816_v54, %v747_v1  ;;  %v849_v11 = vadd.f32 %v817_v45, %v748_v19  ;;  %v1018_v2 = vmul.f32 %v3679_v6, %v3808_v37  ;;  %v1476_v28 = vld [vmem:[#allocation6 + $0x18] sm:$0xff]  ;;  %v1485_v31 = vld [vmem:[#allocation6 + $0x60] sm:$0xff]  ;;  %v1487_v14 = vld [vmem:[#allocation6 + $0x70] sm:$0xff] }
 0x106   : > { %v1019_v46 = vmul.f32 %v3679_v6, %v3810_v63  ;;  %v1370_v55 = vadd.f32 %v1338_v24, %v1269_v59  ;;  %v1119_v7 = vmul.f32 %v3688_v8, %v3830_v44  ;;  %v1120_v32 = vmul.f32 %v3688_v8, %v3832_v9  ;;  %v1478_v24 = vld [vmem:[#allocation6 + $0x28] sm:$0xff]  ;;  %v1488_v36 = vld [vmem:[#allocation6 + $0x78] sm:$0xff]  ;;  %v1594_v54 = vld [vmem:[%s4104_s3] sm:$0xff] }
 0x107   : > { %v1371_v26 = vadd.f32 %v1339_v50, %v1270_v48  ;;  %v949_v17 = vadd.f32 %v917_v34, %v848_v15  ;;  %v950_v61 = vadd.f32 %v918_v12, %v849_v11  ;;  %v1221_v6 = vmul.f32 %v3715_v5, %v1184_v23  ;;  %v1595_v25 = vld [vmem:[%s4104_s3 + $0x8] sm:$0xff]  ;;  %v1596_v50 = vld [vmem:[%s4104_s3 + $0x10] sm:$0xff]  ;;  %v1597_v45 = vld [vmem:[%s4104_s3 + $0x18] sm:$0xff] }
 0x108   : > { %v1471_v49 = vadd.f32 %v1439_v39, %v1370_v55  ;;  %v1222_v63 = vmul.f32 %v3715_v5, %v1185_v41  ;;  %v1322_v44 = vmul.f32 %v3728_v27, %v1285_v51  ;;  %v1323_v33 = vmul.f32 %v3728_v27, %v1286_v40  ;;  %v1477_v27 = vld [vmem:[#allocation6 + $0x20] sm:$0xff] }
 0x109   : > { %v1472_v18 = vadd.f32 %v1440_v10, %v1371_v26  ;;  %v1050_v37 = vadd.f32 %v1018_v2, %v949_v17  ;;  %v1051_v52 = vadd.f32 %v1019_v46, %v950_v61  ;;  %v1423_v60 = vmul.f32 %v3659_v62, %v1386_v30  ;;  %v2039_v30 = vld [vmem:[%s4108_s7 + $0x18] sm:$0xff] }
 0x10a   : > { %v1424_v56 = vmul.f32 %v3659_v62, %v1387_v43  ;;  %v1482_v62 = vld [vmem:[#allocation6 + $0x48] sm:$0xff]  ;;  %v2490_v35 = vpack.c.bf16 %v1595_v25, %v1594_v54  ;;  %v2494_v1 = vpack.c.bf16 %v1597_v45, %v1596_v50 }
 0x10b   : > { %v2486_v53 = vpack.c.bf16 %v1472_v18, %v1471_v49  ;;  %v1151_v38 = vadd.f32 %v1119_v7, %v1050_v37  ;;  %v1152_v16 = vadd.f32 %v1120_v32, %v1051_v52  ;;  %v2036_v52 = vld [vmem:[%s4108_s7] sm:$0xff] }
 0x10c   : > { %2491 = vmatprep.subr.bf16.mxu1 %v2490_v35 }
 0x10d   : > { %2487 = vmatprep.subr.bf16.mxu0 %v2486_v53  ;;  %v1253_v8 = vadd.f32 %v1221_v6, %v1151_v38  ;;  %v1254_v9 = vadd.f32 %v1222_v63, %v1152_v16  ;;  %2493 = vmatpush3.bf16.msra.mxu1 %v2490_v35  ;;  %v2037_v6 = vld [vmem:[%s4108_s7 + $0x8] sm:$0xff]  ;;  %v2038_v53 = vld [vmem:[%s4108_s7 + $0x10] sm:$0xff]  ;;  %v3921_v38 = vld [vmem:[%s4105_s4] ss:$0 sm:$0xff] }
 0x10e   : > { %2495 = vmatprep.subr.bf16.mxu1 %v2494_v1  ;;  %v2498_v63 = vpack.c.bf16 %v2037_v6, %v2036_v52  ;;  %v2502_v43 = vpack.c.bf16 %v2039_v30, %v2038_v53  ;;  %v3964_v35 = vld [vmem:[%s4107_s6 + $0x4] ss:$0 sm:$0xff]  ;;  %v3998_v52 = vld [vmem:[%s4107_s6 + $0x8] ss:$0 sm:$0xff] }
 0x10f   : > { %v1354_v20 = vadd.f32 %v1322_v44, %v1253_v8  ;;  %v1355_v4 = vadd.f32 %v1323_v33, %v1254_v9  ;;  %v3926_v44 = vld [vmem:[%s4106_s5] ss:$0 sm:$0xff] }
 0x111   : > { %v1455_v29 = vadd.f32 %v1423_v60, %v1354_v20  ;;  %v1456_v5 = vadd.f32 %v1424_v56, %v1355_v4  ;;  %2497 = vmatpush3.bf16.msra.mxu1 %v2494_v1  ;;  %v1774_v60 = vld [vmem:[#allocation3] sm:$0xff]  ;;  %v3934_v20 = vld [vmem:[%s4107_s6] ss:$0 sm:$0xff] }
 0x112   : > { %2499 = vmatprep.subr.bf16.mxu1 %v2498_v63  ;;  %v1803_v4 = vld [vmem:[#allocation3 + $0x1] sm:$0xff] }
 0x113   : > { %v2488_v57 = vpack.c.bf16 %v1456_v5, %v1455_v29  ;;  %v3939_v29 = vld [vmem:[%s4107_s6 + $0x1] ss:$0 sm:$0xff] }
 0x115   : > { %2489 = vmatpush3.bf16.msra.mxu0 %v2488_v57 }
 0x118   : > { %1554 = vmatmul.mubr.f32.vlgmr.msra.gmra.mrb[0].mxu0 %v1473_v42 }
 0x119   : > { %1558 = vmatprep.mubr.f32.mxu0 %v1476_v28  ;;  %v1787_v28 = vmul.f32 %v3934_v20, %v1774_v60 }
 0x11c   : > { %1559 = vmatmul.mubr.f32.gmra.mrb[2].mxu0 %v1475_v0  ;;  %v1816_v0 = vmul.f32 %v3939_v29, %v1803_v4 }
 0x11d   : > { %1563 = vmatprep.mubr.f32.mxu0 %v1478_v24  ;;  %v1832_v24 = vld [vmem:[#allocation3 + $0x2] sm:$0xff] }
 0x120   : > { %1564 = vmatmul.mubr.f32.gmra.mrb[4].mxu0 %v1477_v27  ;;  %v3948_v27 = vld [vmem:[%s4107_s6 + $0x2] ss:$0 sm:$0xff] }
 0x121   : > { %1568 = vmatprep.mubr.f32.mxu0 %v1480_v21 }
 0x124   : > { %1569 = vmatmul.mubr.f32.gmra.mrb[6].mxu0 %v1479_v3 }
 0x125   : > { %1573 = vmatprep.mubr.f32.mxu0 %v1482_v62 }
 0x128   : > { %1574 = vmatmul.mubr.f32.gmra.mrb[8].mxu0 %v1481_v58 }
 0x129   : > { %1578 = vmatprep.mubr.f32.mxu0 %v1484_v22  ;;  %v1824_v22 = vadd.f32 %v1816_v0, %v1787_v28 }
 0x12c   : > { %1579 = vmatmul.mubr.f32.gmra.mrb[10].mxu0 %v1483_v47  ;;  %v1845_v47 = vmul.f32 %v3948_v27, %v1832_v24 }
 0x12d   : > { %1583 = vmatprep.mubr.f32.mxu0 %v1486_v13 }
 0x12e   : > { %v1853_v25 = vadd.f32 %v1845_v47, %v1824_v22 }
 0x130   : > { %1584 = vmatmul.mubr.f32.gmra.mrb[12].mxu0 %v1485_v31 }
 0x131   : > { %1588 = vmatprep.mubr.f32.mxu0 %v1488_v36 }
 0x134   : > { %1589 = vmatmul.mubr.f32.gmra.mrb[14].mxu0 %v1487_v14  ;;  %v3959_v14 = vld [vmem:[%s4107_s6 + $0x3] ss:$0 sm:$0xff] }
 0x1eb   : > { %v2370_v19 = vpop.f32.mrb[0].mxu0 }
 0x1ec   : > { %v2371_v34 = vpop.f32.mrb[1].mxu0 }
 0x1ed   : > { %v2372_v12 = vadd.f32 %v2371_v34, %v2370_v19 }
 0x1ef   : > { %v2373_v59 = vpop.f32.mrb[2].mxu0  ;;  %2426 = vmatprep.mubr.msk.f32.mxu1 %vm395_vm0, %v2372_v12 }
 0x1f0   : > { %v2374_v48 = vpop.f32.mrb[3].mxu0 }
 0x1f1   : > { %v2375_v39 = vadd.f32 %v2374_v48, %v2373_v59 }
 0x1f3   : > { %v2376_v10 = vpop.f32.mrb[4].mxu0  ;;  %2427 = vmatmul.mubr.msk.f32.vlgmr.msra.gmra.mrb[0].mxu1 %vm395_vm0, %v2375_v39 }
 0x1f4   : > { %v2377_v15 = vpop.f32.mrb[5].mxu0  ;;  %2501 = vmatpush3.bf16.msra.mxu1 %v2498_v63 }
 0x1f5   : > { %v2378_v11 = vadd.f32 %v2377_v15, %v2376_v10  ;;  %2503 = vmatprep.subr.bf16.mxu1 %v2502_v43  ;;  %v3974_v15 = vld [vmem:[%s4107_s6 + $0x5] ss:$0 sm:$0xff] }
 0x1f7   : > { %v2379_v2 = vpop.f32.mrb[6].mxu0  ;;  %2429 = vmatprep.mubr.msk.f32.mxu1 %vm395_vm0, %v2378_v11 }
 0x1f8   : > { %v2380_v46 = vpop.f32.mrb[7].mxu0  ;;  %2505 = vmatpush3.bf16.msra.mxu1 %v2502_v43 }
 0x1f9   : > { %v2381_v55 = vadd.f32 %v2380_v46, %v2379_v2 }
 0x1fb   : > { %v2382_v26 = vpop.f32.mrb[8].mxu0  ;;  %2430 = vmatmul.mubr.msk.f32.gmra.mrb[2].mxu1 %vm395_vm0, %v2381_v55 }
 0x1fc   : > { %v2383_v23 = vpop.f32.mrb[9].mxu0 }
 0x1fd   : > { %v2384_v41 = vadd.f32 %v2383_v23, %v2382_v26 }
 0x1ff   : > { %v2385_v17 = vpop.f32.mrb[10].mxu0  ;;  %2432 = vmatprep.mubr.msk.f32.mxu1 %vm395_vm0, %v2384_v41  ;;  %v3984_v41 = vld [vmem:[%s4107_s6 + $0x6] ss:$0 sm:$0xff] }
 0x200   : > { %v2386_v61 = vpop.f32.mrb[11].mxu0 }
 0x201   : > { %v2387_v7 = vadd.f32 %v2386_v61, %v2385_v17 }
 0x203   : > { %v2388_v32 = vpop.f32.mrb[12].mxu0  ;;  %2433 = vmatmul.mubr.msk.f32.gmra.mrb[4].mxu1 %vm395_vm0, %v2387_v7 }
 0x204   : > { %v2389_v49 = vpop.f32.mrb[13].mxu0 }
 0x205   : > { %v2390_v18 = vadd.f32 %v2389_v49, %v2388_v32 }
 0x207   : > { %v2391_v51 = vpop.f32.mrb[14].mxu0  ;;  %2435 = vmatprep.mubr.msk.f32.mxu1 %vm395_vm0, %v2390_v18 }
 0x208   : > { %v2392_v40 = vpop.f32.mrb[15].mxu0 }
 0x209   : > { %v2393_v37 = vadd.f32 %v2392_v40, %v2391_v51  ;;  %v3993_v40 = vld [vmem:[%s4107_s6 + $0x7] ss:$0 sm:$0xff] }
 0x20b   : > { %2436 = vmatmul.mubr.msk.f32.gmra.mrb[6].mxu1 %vm395_vm0, %v2393_v37 }
 0x2c6   : > { %v2428_v16 = vpop.f32.mrb[0].mxu1 }
 0x2c7   : > { %v1735_v33 = vmul.f32 %v2428_v16, %v3921_v38  ;;  %v1688_v8 = vpop.f32.mrb[1].mxu1 }
 0x2c8   : > { %v1734_v9 = vmul.f32 %v3921_v38, %v1688_v8 }
 0x2c9   : > { %v1750_v56 = vadd.f32 %v3926_v44, %v1735_v33 }
 0x2ca   : > { %v1749_v5 = vadd.f32 %v3926_v44, %v1734_v9 }
 0x2cb   : > { %v1758_v57 = vmax.f32 %v1750_v56, 0.0 }
 0x2cc   : > { %v1757_v42 = vmax.f32 %v1749_v5, 0.0 }
 0x2cd   : > { %1767 = vst.msk [vmem:[#allocation3 + $0x21] sm:$0xff] %vm395_vm0, %v1758_v57 }
 0x2ce   : > { %1766 = vst.msk [vmem:[#allocation3 + $0x11] sm:$0xff] %vm395_vm0, %v1757_v42  ;;  %v2431_v21 = vpop.f32.mrb[2].mxu1 }
 0x2cf   : > { %v1737_v3 = vmul.f32 %v2431_v21, %v3921_v38  ;;  %v1698_v62 = vpop.f32.mrb[3].mxu1 }
 0x2d0   : > { %v1736_v58 = vmul.f32 %v3921_v38, %v1698_v62 }
 0x2d1   : > { %v1752_v13 = vadd.f32 %v3926_v44, %v1737_v3 }
 0x2d2   : > { %v1751_v31 = vadd.f32 %v3926_v44, %v1736_v58 }
 0x2d3   : > { %v1760_v36 = vmax.f32 %v1752_v13, 0.0 }
 0x2d4   : > { %v1759_v54 = vmax.f32 %v1751_v31, 0.0  ;;  %v1949_v1 = vld [vmem:[#allocation3 + $0x20] sm:$0xff] }
 0x2d5   : > { %1769 = vst.msk [vmem:[#allocation3 + $0x41] sm:$0xff] %vm395_vm0, %v1760_v36  ;;  %v1861_v50 = vld [vmem:[#allocation3 + $0x10] sm:$0xff]  ;;  %v1978_v59 = vld [vmem:[#allocation3 + $0x21] sm:$0xff]  ;;  %v1789_v26 = vmul.f32 %v3934_v20, %v1949_v1  ;;  %v1875_v63 = vmul.f32 %v3959_v14, %v1949_v1  ;;  %v1962_v16 = vmul.f32 %v3984_v41, %v1949_v1 }
 0x2d6   : > { %v1890_v45 = vld [vmem:[#allocation3 + $0x11] sm:$0xff]  ;;  %1768 = vst.msk [vmem:[#allocation3 + $0x31] sm:$0xff] %vm395_vm0, %v1759_v54  ;;  %v2434_v19 = vpop.f32.mrb[4].mxu1  ;;  %v1874_v34 = vmul.f32 %v3959_v14, %v1861_v50  ;;  %v1788_v48 = vmul.f32 %v3934_v20, %v1861_v50  ;;  %v2007_v17 = vld [vmem:[#allocation3 + $0x22] sm:$0xff]  ;;  %v1818_v32 = vmul.f32 %v3939_v29, %v1978_v59  ;;  %v1991_v9 = vmul.f32 %v3993_v40, %v1978_v59 }
 0x2d7   : > { %v1919_v12 = vld [vmem:[#allocation3 + $0x12] sm:$0xff]  ;;  %v1739_v39 = vmul.f32 %v2434_v19, %v3921_v38  ;;  %v1708_v10 = vpop.f32.mrb[5].mxu1  ;;  %v1817_v11 = vmul.f32 %v3939_v29, %v1890_v45  ;;  %v1903_v55 = vmul.f32 %v3964_v35, %v1890_v45  ;;  %v1847_v33 = vmul.f32 %v3948_v27, %v2007_v17 }
 0x2d8   : > { %v1738_v2 = vmul.f32 %v3921_v38, %v1708_v10  ;;  %v1882_v46 = vadd.f32 %v1874_v34, %v1853_v25  ;;  %v1846_v7 = vmul.f32 %v3948_v27, %v1919_v12  ;;  %v1932_v51 = vmul.f32 %v3974_v15, %v1919_v12 }
 0x2d9   : > { %v1754_v23 = vadd.f32 %v3926_v44, %v1739_v39  ;;  %v1825_v61 = vadd.f32 %v1817_v11, %v1788_v48  ;;  %v1826_v53 = vadd.f32 %v1818_v32, %v1789_v26  ;;  %v1904_v56 = vmul.f32 %v3964_v35, %v1978_v59 }
 0x2da   : > { %v1753_v49 = vadd.f32 %v3926_v44, %v1738_v2  ;;  %v1911_v18 = vadd.f32 %v1903_v55, %v1882_v46  ;;  %v2020_v28 = vmul.f32 %v3998_v52, %v2007_v17  ;;  %v1933_v0 = vmul.f32 %v3974_v15, %v2007_v17 }
 0x2db   : > { %v1762_v37 = vmax.f32 %v1754_v23, 0.0  ;;  %v1854_v6 = vadd.f32 %v1846_v7, %v1825_v61  ;;  %v1855_v24 = vadd.f32 %v1847_v33, %v1826_v53 }
 0x2dc   : > { %v1761_v30 = vmax.f32 %v1753_v49, 0.0  ;;  %v1940_v43 = vadd.f32 %v1932_v51, %v1911_v18  ;;  %v1951_v8 = vld [vmem:[#allocation3 + $0x40] sm:$0xff] }
 0x2dd   : > { %1771 = vst.msk [vmem:[#allocation3 + $0x61] sm:$0xff] %vm395_vm0, %v1762_v37  ;;  %v1883_v60 = vadd.f32 %v1875_v63, %v1854_v6  ;;  %v1950_v4 = vld [vmem:[#allocation3 + $0x30] sm:$0xff]  ;;  %v1964_v22 = vmul.f32 %v3984_v41, %v1951_v8  ;;  %v1980_v59 = vld [vmem:[#allocation3 + $0x41] sm:$0xff]  ;;  %v1791_v7 = vmul.f32 %v3934_v20, %v1951_v8  ;;  %v1877_v51 = vmul.f32 %v3959_v14, %v1951_v8 }
 0x2de   : > { %v1979_v5 = vld [vmem:[#allocation3 + $0x31] sm:$0xff]  ;;  %1770 = vst.msk [vmem:[#allocation3 + $0x51] sm:$0xff] %vm395_vm0, %v1761_v30  ;;  %v2437_v57 = vpop.f32.mrb[6].mxu1  ;;  %v1970_v42 = vadd.f32 %v1962_v16, %v1940_v43  ;;  %v1876_v58 = vmul.f32 %v3959_v14, %v1950_v4  ;;  %v1963_v31 = vmul.f32 %v3984_v41, %v1950_v4  ;;  %v1790_v1 = vmul.f32 %v3934_v20, %v1950_v4  ;;  %v2009_v55 = vld [vmem:[#allocation3 + $0x42] sm:$0xff] }
 0x2df   : > { %v1741_v21 = vmul.f32 %v2437_v57, %v3921_v38  ;;  %v1718_v3 = vpop.f32.mrb[7].mxu1  ;;  %v1912_v62 = vadd.f32 %v1904_v56, %v1883_v60  ;;  %v2008_v36 = vld [vmem:[#allocation3 + $0x32] sm:$0xff]  ;;  %v1905_v54 = vmul.f32 %v3964_v35, %v1979_v5  ;;  %v1992_v12 = vmul.f32 %v3993_v40, %v1979_v5 }
 0x2e0   : > { %v1740_v47 = vmul.f32 %v3921_v38, %v1718_v3  ;;  %v1999_v13 = vadd.f32 %v1991_v9, %v1970_v42  ;;  %v1884_v45 = vadd.f32 %v1876_v58, %v1855_v24  ;;  %v1819_v38 = vmul.f32 %v3939_v29, %v1979_v5 }
 0x2e1   : > { %v1756_v25 = vadd.f32 %v3926_v44, %v1741_v21  ;;  %v1941_v50 = vadd.f32 %v1933_v0, %v1912_v62  ;;  %v1934_v11 = vmul.f32 %v3974_v15, %v2008_v36  ;;  %v2021_v46 = vmul.f32 %v3998_v52, %v2008_v36 }
 0x2e2   : > { %v1755_v19 = vadd.f32 %v3926_v44, %v1740_v47  ;;  %v2028_v34 = vadd.f32 %v2020_v28, %v1999_v13  ;;  %v1913_v10 = vadd.f32 %v1905_v54, %v1884_v45  ;;  %v1827_v26 = vadd.f32 %v1819_v38, %v1790_v1 }
 0x2e3   : > { %v1764_v48 = vmax.f32 %v1756_v25, 0.0  ;;  %v1971_v39 = vadd.f32 %v1963_v31, %v1941_v50  ;;  %v1848_v44 = vmul.f32 %v3948_v27, %v2008_v36  ;;  %v1820_v32 = vmul.f32 %v3939_v29, %v1980_v59 }
 0x2e4   : > { %v1763_v2 = vmax.f32 %v1755_v19, 0.0  ;;  %2446 = vmatprep.mubr.msk.f32.mxu1 %vm395_vm0, %v2028_v34  ;;  %v1942_v17 = vadd.f32 %v1934_v11, %v1913_v10  ;;  %v1993_v49 = vmul.f32 %v3993_v40, %v1980_v59  ;;  %v1849_v30 = vmul.f32 %v3948_v27, %v2009_v55  ;;  %v1953_v57 = vld [vmem:[#allocation3 + $0x60] sm:$0xff] }
 0x2e5   : > { %1773 = vst.msk [vmem:[#allocation3 + $0x81] sm:$0xff] %vm395_vm0, %v1764_v48  ;;  %v2000_v23 = vadd.f32 %v1992_v12, %v1971_v39  ;;  %v1952_v61 = vld [vmem:[#allocation3 + $0x50] sm:$0xff]  ;;  %v1856_v18 = vadd.f32 %v1848_v44, %v1827_v26  ;;  %v1828_v53 = vadd.f32 %v1820_v32, %v1791_v7  ;;  %v1906_v16 = vmul.f32 %v3964_v35, %v1980_v59  ;;  %v1982_v42 = vld [vmem:[#allocation3 + $0x61] sm:$0xff] }
 0x2e6   : > { %1772 = vst.msk [vmem:[#allocation3 + $0x71] sm:$0xff] %vm395_vm0, %v1763_v2  ;;  %v1972_v6 = vadd.f32 %v1964_v22, %v1942_v17  ;;  %v1981_v63 = vld [vmem:[#allocation3 + $0x51] sm:$0xff]  ;;  %v1878_v33 = vmul.f32 %v3959_v14, %v1952_v61  ;;  %v2022_v60 = vmul.f32 %v3998_v52, %v2009_v55  ;;  %v1935_v8 = vmul.f32 %v3974_v15, %v2009_v55  ;;  %v2011_v47 = vld [vmem:[#allocation3 + $0x62] sm:$0xff] }
 0x2e7   : > { %v2029_v37 = vadd.f32 %v2021_v46, %v2000_v23  ;;  %v1885_v43 = vadd.f32 %v1877_v51, %v1856_v18  ;;  %v2010_v56 = vld [vmem:[#allocation3 + $0x52] sm:$0xff]  ;;  %v1857_v4 = vadd.f32 %v1849_v30, %v1828_v53  ;;  %v1792_v28 = vmul.f32 %v3934_v20, %v1952_v61 }
 0x2e8   : > { %v2001_v9 = vadd.f32 %v1993_v49, %v1972_v6  ;;  %v1821_v0 = vmul.f32 %v3939_v29, %v1981_v63  ;;  %v1965_v21 = vmul.f32 %v3984_v41, %v1952_v61  ;;  %v1907_v62 = vmul.f32 %v3964_v35, %v1981_v63 }
 0x2e9   : > { %2447 = vmatmul.mubr.msk.f32.vlgmr.msra.gmra.mrb[8].mxu1 %vm395_vm0, %v2029_v37  ;;  %v1914_v5 = vadd.f32 %v1906_v16, %v1885_v43  ;;  %v1886_v3 = vadd.f32 %v1878_v33, %v1857_v4  ;;  %v1994_v22 = vmul.f32 %v3993_v40, %v1981_v63  ;;  %v1850_v31 = vmul.f32 %v3948_v27, %v2010_v56 }
 0x2ea   : > { %v2030_v24 = vadd.f32 %v2022_v60, %v2001_v9  ;;  %v1829_v13 = vadd.f32 %v1821_v0, %v1792_v28  ;;  %v1936_v54 = vmul.f32 %v3974_v15, %v2010_v56  ;;  %v1793_v50 = vmul.f32 %v3934_v20, %v1953_v57  ;;  %v1956_v28 = vld [vmem:[#allocation3 + $0x90] sm:$0xff] }
 0x2eb   : > { %v1943_v58 = vadd.f32 %v1935_v8, %v1914_v5  ;;  %v1915_v36 = vadd.f32 %v1907_v62, %v1886_v3  ;;  %v1822_v45 = vmul.f32 %v3939_v29, %v1982_v42  ;;  %v1966_v19 = vmul.f32 %v3984_v41, %v1953_v57 }
 0x2ec   : > { %2449 = vmatprep.mubr.msk.f32.mxu1 %vm395_vm0, %v2030_v24  ;;  %v1858_v34 = vadd.f32 %v1850_v31, %v1829_v13  ;;  %v1879_v12 = vmul.f32 %v3959_v14, %v1953_v57  ;;  %v1851_v48 = vmul.f32 %v3948_v27, %v2011_v47  ;;  %v2023_v11 = vmul.f32 %v3998_v52, %v2010_v56  ;;  %v1955_v16 = vld [vmem:[#allocation3 + $0x80] sm:$0xff]  ;;  %v1985_v13 = vld [vmem:[#allocation3 + $0x91] sm:$0xff] }
 0x2ed   : > { %v1954_v25 = vld [vmem:[#allocation3 + $0x70] sm:$0xff]  ;;  %v1973_v1 = vadd.f32 %v1965_v21, %v1943_v58  ;;  %v1944_v59 = vadd.f32 %v1936_v54, %v1915_v36  ;;  %v1830_v38 = vadd.f32 %v1822_v45, %v1793_v50  ;;  %v1908_v46 = vmul.f32 %v3964_v35, %v1982_v42  ;;  %v1984_v5 = vld [vmem:[#allocation3 + $0x81] sm:$0xff] }
 0x2ee   : > { %v1880_v39 = vmul.f32 %v3959_v14, %v1954_v25  ;;  %v1887_v2 = vadd.f32 %v1879_v12, %v1858_v34  ;;  %v1983_v55 = vld [vmem:[#allocation3 + $0x71] sm:$0xff]  ;;  %v1995_v44 = vmul.f32 %v3993_v40, %v1982_v42  ;;  %v2024_v23 = vmul.f32 %v3998_v52, %v2011_v47  ;;  %v2013_v21 = vld [vmem:[#allocation3 + $0x82] sm:$0xff] }
 0x2ef   : > { %v2002_v10 = vadd.f32 %v1994_v22, %v1973_v1  ;;  %v1974_v26 = vadd.f32 %v1966_v19, %v1944_v59  ;;  %v2012_v17 = vld [vmem:[#allocation3 + $0x72] sm:$0xff]  ;;  %v1859_v61 = vadd.f32 %v1851_v48, %v1830_v38  ;;  %v1937_v49 = vmul.f32 %v3974_v15, %v2011_v47 }
 0x2f0   : > { %v1916_v32 = vadd.f32 %v1908_v46, %v1887_v2  ;;  %v1794_v18 = vmul.f32 %v3934_v20, %v1954_v25  ;;  %v1909_v6 = vmul.f32 %v3964_v35, %v1983_v55  ;;  %v1823_v63 = vmul.f32 %v3939_v29, %v1983_v55 }
 0x2f1   : > { %v2031_v7 = vadd.f32 %v2023_v11, %v2002_v10  ;;  %v2003_v51 = vadd.f32 %v1995_v44, %v1974_v26  ;;  %v1888_v37 = vadd.f32 %v1880_v39, %v1859_v61  ;;  %v1967_v30 = vmul.f32 %v3984_v41, %v1954_v25  ;;  %v2014_v25 = vld [vmem:[#allocation3 + $0x92] sm:$0xff] }
 0x2f2   : > { %v1945_v53 = vadd.f32 %v1937_v49, %v1916_v32  ;;  %v1938_v43 = vmul.f32 %v3974_v15, %v2012_v17  ;;  %v1831_v60 = vadd.f32 %v1823_v63, %v1794_v18  ;;  %v1852_v56 = vmul.f32 %v3948_v27, %v2012_v17 }
 0x2f3   : > { %2450 = vmatmul.mubr.msk.f32.gmra.mrb[10].mxu1 %vm395_vm0, %v2031_v7  ;;  %v2032_v33 = vadd.f32 %v2024_v23, %v2003_v51  ;;  %v1917_v9 = vadd.f32 %v1909_v6, %v1888_v37  ;;  %v1996_v4 = vmul.f32 %v3993_v40, %v1983_v55  ;;  %v1968_v8 = vmul.f32 %v3984_v41, %v1955_v16 }
 0x2f4   : > { %v1975_v20 = vadd.f32 %v1967_v30, %v1945_v53  ;;  %v1860_v57 = vadd.f32 %v1852_v56, %v1831_v60  ;;  %v1881_v42 = vmul.f32 %v3959_v14, %v1955_v16  ;;  %v2025_v24 = vmul.f32 %v3998_v52, %v2012_v17 }
 0x2f5   : > { %2452 = vmatprep.mubr.msk.f32.mxu1 %vm395_vm0, %v2032_v33  ;;  %v1946_v29 = vadd.f32 %v1938_v43, %v1917_v9  ;;  %v1997_v27 = vmul.f32 %v3993_v40, %v1984_v5  ;;  %v1910_v58 = vmul.f32 %v3964_v35, %v1984_v5  ;;  %v1969_v47 = vmul.f32 %v3984_v41, %v1956_v28 }
 0x2f6   : > { %v2004_v0 = vadd.f32 %v1996_v4, %v1975_v20  ;;  %v1889_v62 = vadd.f32 %v1881_v42, %v1860_v57  ;;  %v2026_v14 = vmul.f32 %v3998_v52, %v2013_v21  ;;  %v1939_v54 = vmul.f32 %v3974_v15, %v2013_v21  ;;  %v2332_v15 = vld [vmem:[%s4109_s8] ss:$0 sm:$0xff] }
 0x2f7   : > { %v1976_v3 = vadd.f32 %v1968_v8, %v1946_v29  ;;  %v1998_v1 = vmul.f32 %v3993_v40, %v1985_v13  ;;  %v2027_v41 = vmul.f32 %v3998_v52, %v2014_v25  ;;  %v2333_v40 = vld [vmem:[%s4110_s9] ss:$0 sm:$0xff] }
 0x2f8   : > { %v2033_v22 = vadd.f32 %v2025_v24, %v2004_v0  ;;  %v1918_v36 = vadd.f32 %v1910_v58, %v1889_v62 }
 0x2f9   : > { %v2005_v31 = vadd.f32 %v1997_v27, %v1976_v3 }
 0x2fa   : > { %2453 = vmatmul.mubr.msk.f32.gmra.mrb[12].mxu1 %vm395_vm0, %v2033_v22  ;;  %v1947_v45 = vadd.f32 %v1939_v54, %v1918_v36 }
 0x2fb   : > { %v2034_v50 = vadd.f32 %v2026_v14, %v2005_v31 }
 0x2fc   : > { %v1977_v35 = vadd.f32 %v1969_v47, %v1947_v45 }
 0x2fd   : > { %2455 = vmatprep.mubr.msk.f32.mxu1 %vm395_vm0, %v2034_v50 }
 0x2fe   : > { %v2006_v19 = vadd.f32 %v1998_v1, %v1977_v35 }
 0x300   : > { %v2035_v34 = vadd.f32 %v2027_v41, %v2006_v19 }
 0x302   : > { %2456 = vmatmul.mubr.msk.f32.gmra.mrb[14].mxu1 %vm395_vm0, %v2035_v34 }
 0x3bc   : > { %v2448_v12 = vpop.f32.mrb[8].mxu1 }
 0x3bd   : > { %v2177_v59 = vmul.f32 %v2448_v12, %v2332_v15  ;;  %v2130_v38 = vpop.f32.mrb[9].mxu1 }
 0x3be   : > { %v2176_v52 = vmul.f32 %v2332_v15, %v2130_v38 }
 0x3bf   : > { %v2192_v48 = vadd.f32 %v2333_v40, %v2177_v59 }
 0x3c0   : > { %v2191_v39 = vadd.f32 %v2333_v40, %v2176_v52 }
 0x3c1   : > { %2200 = vst [vmem:[%s394_s26 + $0x8] sm:$0xff] %v2192_v48 }
 0x3c2   : > { %2199 = vst [vmem:[%s394_s26] sm:$0xff] %v2191_v39 }
 0x3c6   : > { %v2451_v10 = vpop.f32.mrb[10].mxu1 }
 0x3c7   : > { %v2179_v11 = vmul.f32 %v2451_v10, %v2332_v15  ;;  %v2140_v2 = vpop.f32.mrb[11].mxu1 }
 0x3c8   : > { %v2178_v46 = vmul.f32 %v2332_v15, %v2140_v2 }
 0x3c9   : > { %v2194_v55 = vadd.f32 %v2333_v40, %v2179_v11 }
 0x3ca   : > { %v2193_v26 = vadd.f32 %v2333_v40, %v2178_v46 }
 0x3cb   : > { %2202 = vst [vmem:[%s394_s26 + $0x18] sm:$0xff] %v2194_v55 }
 0x3cc   : > { %2201 = vst [vmem:[%s394_s26 + $0x10] sm:$0xff] %v2193_v26 }
 0x3cd   : > { %v2454_v44 = vpop.f32.mrb[12].mxu1 }
 0x3ce   : > { %v2181_v23 = vmul.f32 %v2454_v44, %v2332_v15  ;;  %v2150_v17 = vpop.f32.mrb[13].mxu1 }
 0x3cf   : > { %v2180_v61 = vmul.f32 %v2332_v15, %v2150_v17 }
 0x3d0   : > { %v2196_v7 = vadd.f32 %v2333_v40, %v2181_v23 }
 0x3d1   : > { %v2195_v32 = vadd.f32 %v2333_v40, %v2180_v61 }
 0x3d2   : > { %2204 = vst [vmem:[%s394_s26 + $0x28] sm:$0xff] %v2196_v7 }
 0x3d3   : > { %2203 = vst [vmem:[%s394_s26 + $0x20] sm:$0xff] %v2195_v32 }
 0x3d5   : > { %v2457_v49 = vpop.f32.mrb[14].mxu1 }
 0x3d6   : > { %v2183_v18 = vmul.f32 %v2457_v49, %v2332_v15  ;;  %v2160_v51 = vpop.f32.mrb[15].mxu1 }
 0x3d7   : > { %v2182_v37 = vmul.f32 %v2332_v15, %v2160_v51 }
 0x3d8   : > { %v2198_v6 = vadd.f32 %v2333_v40, %v2183_v18 }
 0x3d9   : > { %v2197_v63 = vadd.f32 %v2333_v40, %v2182_v37 }
 0x3da   : > { %2206 = vst [vmem:[%s394_s26 + $0x38] sm:$0xff] %v2198_v6 }
 0x3db   : > { %2205 = vst [vmem:[%s394_s26 + $0x30] sm:$0xff] %v2197_v63 }
 0x3dc PF: > { %s4128_s16 = sld [smem:[#allocation10_spill]]  ;;  %s4129_s13 = smov %s2658_s14 }
 0x3dd   : > { %s4130_s14 = smov %s2662_s15  ;;  %s4131_s15 = smov %s2800_s29 }
 0x3e2   : > { %p21_p8 = scmp.ge.s32.totalorder %s4128_s16, 4  }
 0x3e4   :  { %23 = sbr.rel (!%p21_p8) target bundleno = 6 (0x6), region = 110 }
 0x3eb   :  { %2228 = vsyncpa [#allocation5], 1 }
 0x3ec   :  { %2230 = vsyncpa [#allocation5 + $0x1], 1 }
 0x3ed   :  { %2231 = vsyncpa [#allocation7], 1 }

</bundles_post_ra>
